<compile_context>
chip_gen: v7x
topology: tpu7x:2x2x1
jax: 0.10.0
libtpu: 0.0.40
codegen_flags: <defaults>
</compile_context>

<pallas_src>
import jax
import jax.numpy as jnp
from jax.experimental import pallas as pl
from jax.experimental.pallas import tpu as pltpu

# ---- small synthetic config (MiniLM-L12 is 384/12/12/1536 — scaled down) ----
BATCH = 2
SEQ = 8
HIDDEN = 32
HEADS = 4
HEAD_DIM = HIDDEN // HEADS
INTER = 64
LAYERS = 2
VOCAB = 100
MAX_POS = 16
TYPE_VOCAB = 2
EPS = 1e-12
SCALE = 1.0 / float(HEAD_DIM) ** 0.5
POOL_PAD = 128                      # lane-dense padded width of the pooled block
ROWS = BATCH * SEQ


# ----------------------------- in-kernel helpers -----------------------------

def _gelu(x):
    # TODO(synk): HF BERT uses exact erf-GELU; tanh approximation used here
    # (numerically very close, lowers cleanly on VPU/EUP).
    c = jnp.sqrt(2.0 / jnp.pi).astype(x.dtype)
    return 0.5 * x * (1.0 + jnp.tanh(c * (x + 0.044715 * x * x * x)))


def _layernorm(x, g, b):
    mu = jnp.mean(x, axis=-1, keepdims=True)
    var = jnp.mean(jnp.square(x - mu), axis=-1, keepdims=True)
    return (x - mu) * jax.lax.rsqrt(var + EPS) * g + b


# ------------------------------ fused kernel ---------------------------------

def _encoder_kernel(words_ref, pos_ref, type_ref, mask_ref,
                    eg_ref, eb_ref,
                    wqkv_ref, bqkv_ref, wo_ref, bo_ref, g1_ref, b1_ref,
                    wi_ref, bi_ref, wf_ref, bf_ref, g2_ref, b2_ref,
                    pw_ref, pb_ref,
                    hidden_ref, pooled_ref):
    """Whole batch in one block: embeddings-LN -> 2 encoder layers -> pooler."""
    # ---- embeddings: word rows (gathered in XLA) + position + token_type(=0) ----
    pos = pos_ref[0:SEQ, :]                                    # (S, H)
    pos_rows = jnp.concatenate([pos] * BATCH, axis=0)          # (B*S, H)
    x = words_ref[...] + pos_rows + type_ref[0:1, :]           # (B*S, H)
    x = _layernorm(x, eg_ref[...], eb_ref[...])

    # additive attention mask, broadcast once to (B*HEADS, 1, S) (hoisted out of
    # the layer loop so the broadcast is not re-emitted per layer).
    amask = (1.0 - mask_ref[...]) * jnp.float32(-1e9)          # (B, S)
    mask_bh = jnp.concatenate(
        [jnp.broadcast_to(amask[b:b + 1, :][None], (HEADS, 1, SEQ))
         for b in range(BATCH)], axis=0)                       # (B*HEADS, 1, S)

    for l in range(LAYERS):                                    # static unroll
        # ---- self attention: fused QKV projection for all rows at once ----
        qkv = (jnp.dot(x, wqkv_ref[l], preferred_element_type=jnp.float32)
               + bqkv_ref[l])                                  # (B*S, 3H)

        def heads(col0, _qkv=qkv):
            # head-major (B*HEADS, S, Dh) slab from static row/lane slices
            return jnp.stack(
                [_qkv[b * SEQ:(b + 1) * SEQ,
                      col0 + h * HEAD_DIM: col0 + (h + 1) * HEAD_DIM]
                 for b in range(BATCH) for h in range(HEADS)], axis=0)

        q = heads(0)
        k = heads(HIDDEN)
        v = heads(2 * HIDDEN)

        # batched attention over all (batch, head) pairs.
        # 1/sqrt(head_dim) is pre-folded into the Q columns of wqkv/bqkv.
        s = jnp.einsum('nqd,nkd->nqk', q, k,
                       preferred_element_type=jnp.float32) + mask_bh
        s = s - jnp.max(s, axis=-1, keepdims=True)
        p = jnp.exp(s)
        p = p * pl.reciprocal(jnp.sum(p, axis=-1, keepdims=True), approx=True)
        ctx = jnp.einsum('nqk,nkd->nqd', p, v,
                         preferred_element_type=jnp.float32)   # (B*HEADS, S, Dh)

        # merge heads back onto the lane axis with register concats
        # (no VMEM scratch, no masked partial stores, no store->load dependency).
        ctx_flat = jnp.concatenate(
            [jnp.concatenate([ctx[b * HEADS + h] for h in range(HEADS)], axis=-1)
             for b in range(BATCH)], axis=0)                   # (B*S, H)

        attn = (jnp.dot(ctx_flat, wo_ref[l],
                        preferred_element_type=jnp.float32) + bo_ref[l])
        x = _layernorm(attn + x, g1_ref[l], b1_ref[l])

        # ---- feed forward ----
        inter = _gelu(jnp.dot(x, wi_ref[l],
                              preferred_element_type=jnp.float32) + bi_ref[l])
        ffn = (jnp.dot(inter, wf_ref[l],
                       preferred_element_type=jnp.float32) + bf_ref[l])
        x = _layernorm(ffn + x, g2_ref[l], b2_ref[l])

    # ---- lane-dense outputs ----
    # hidden: (B, S*H) = (2, 256) — last dim multiple of 128 -> unmasked stores.
    hidden_ref[...] = jnp.concatenate(
        [jnp.concatenate([x[b * SEQ + t: b * SEQ + t + 1, :] for t in range(SEQ)],
                         axis=-1)
         for b in range(BATCH)], axis=0)

    # pooler: tanh(dense(CLS)); padded to 128 lanes for an unmasked store.
    cls = jnp.concatenate([x[b * SEQ: b * SEQ + 1, :] for b in range(BATCH)], axis=0)
    pooled = jnp.tanh(
        jnp.dot(cls, pw_ref[...], preferred_element_type=jnp.float32)
        + pb_ref[...])                                         # (B, H)
    pooled_ref[...] = jnp.concatenate(
        [pooled, jnp.zeros((BATCH, POOL_PAD - HIDDEN), jnp.float32)], axis=-1)


# ------------------------------ pallas wrapper --------------------------------

def _full_spec(shape):
    """Whole array as a single VMEM block (grid has a single step)."""
    nd = len(shape)
    return pl.BlockSpec(tuple(shape), lambda i, _nd=nd: (0,) * _nd)


def encoder_pallas(words, mask_f32, params):
    """words: (B*S, H) f32 word-gathered embeddings, mask_f32: (B, S) f32."""
    weight_names = ("emb_ln_g", "emb_ln_b",
                    "wqkv", "bqkv", "wo", "bo", "ln1_g", "ln1_b",
                    "wi", "bi", "wf", "bf", "ln2_g", "ln2_b",
                    "pooler_w", "pooler_b")
    weights = [params[k] for k in weight_names]
    inputs = [words, params["pos_emb"], params["type_emb"], mask_f32] + weights

    hidden_flat, pooled_pad = pl.pallas_call(
        _encoder_kernel,
        out_shape=(jax.ShapeDtypeStruct((BATCH, SEQ * HIDDEN), jnp.float32),
                   jax.ShapeDtypeStruct((BATCH, POOL_PAD), jnp.float32)),
        grid=(1,),   # whole (tiny) batch in one block; single core, one pipeline step
        in_specs=[_full_spec(a.shape) for a in inputs],
        out_specs=(_full_spec((BATCH, SEQ * HIDDEN)),
                   _full_spec((BATCH, POOL_PAD))),
        compiler_params=pltpu.CompilerParams(
            dimension_semantics=("arbitrary",),
            # explicit scoped-VMEM hook (matters once scaled to real MiniLM-L12;
            # on v5e the default is only 16 MiB).
            vmem_limit_bytes=32 * 1024 * 1024),
    )(*inputs)

    hidden = hidden_flat.reshape(BATCH, SEQ, HIDDEN)   # free layout plumbing
    pooled = pooled_pad[:, :HIDDEN]
    return hidden, pooled


# ------------------------- parameters (synthetic) -----------------------------

def init_params(key):
    def nrm(k, shape, scale=0.02):
        return scale * jax.random.normal(k, shape, dtype=jnp.float32)

    keys = jax.random.split(key, 8)

    wqkv = nrm(keys[3], (LAYERS, HIDDEN, 3 * HIDDEN))
    bqkv = jnp.zeros((LAYERS, 1, 3 * HIDDEN), jnp.float32)
    # Fold 1/sqrt(head_dim) into the Q projection (mathematically equivalent to
    # scaling the attention scores; removes a VALU multiply per layer in-kernel).
    wqkv = wqkv.at[:, :, :HIDDEN].multiply(SCALE)
    bqkv = bqkv.at[:, :, :HIDDEN].multiply(SCALE)

    return {
        "word_emb": nrm(keys[0], (VOCAB, HIDDEN)),
        "pos_emb": nrm(keys[1], (MAX_POS, HIDDEN)),
        "type_emb": nrm(keys[2], (TYPE_VOCAB, HIDDEN)),
        "emb_ln_g": jnp.ones((1, HIDDEN), jnp.float32),
        "emb_ln_b": jnp.zeros((1, HIDDEN), jnp.float32),
        # per-layer weights stacked on a leading layer axis; Q|K|V concatenated.
        "wqkv": wqkv,
        "bqkv": bqkv,
        "wo": nrm(keys[4], (LAYERS, HIDDEN, HIDDEN)),
        "bo": jnp.zeros((LAYERS, 1, HIDDEN), jnp.float32),
        "ln1_g": jnp.ones((LAYERS, 1, HIDDEN), jnp.float32),
        "ln1_b": jnp.zeros((LAYERS, 1, HIDDEN), jnp.float32),
        "wi": nrm(keys[5], (LAYERS, HIDDEN, INTER)),
        "bi": jnp.zeros((LAYERS, 1, INTER), jnp.float32),
        "wf": nrm(keys[6], (LAYERS, INTER, HIDDEN)),
        "bf": jnp.zeros((LAYERS, 1, HIDDEN), jnp.float32),
        "ln2_g": jnp.ones((LAYERS, 1, HIDDEN), jnp.float32),
        "ln2_b": jnp.zeros((LAYERS, 1, HIDDEN), jnp.float32),
        "pooler_w": nrm(keys[7], (HIDDEN, HIDDEN)),
        "pooler_b": jnp.zeros((1, HIDDEN), jnp.float32),
    }


# ------------------------------ forward pass ----------------------------------

def minilm_forward(params, input_ids, attention_mask, eval=False):
    B, S = input_ids.shape
    # Only the data-dependent word-embedding gather stays in XLA; pos/type adds,
    # embedding LayerNorm, mask arithmetic, both encoder layers and the pooler
    # all run inside the single fused Pallas kernel.
    # TODO(synk): token_type_ids hard-coded to 0 and dropout omitted (HF eval
    # behaviour when no segment ids are supplied).
    words = jnp.take(params["word_emb"], input_ids.reshape(-1), axis=0)  # (B*S, H)
    mask_f32 = attention_mask.astype(jnp.float32)                        # (B, S)

    hidden, pooled = encoder_pallas(words, mask_f32, params)

    if eval:
        return hidden, pooled   # ~ (last_hidden_state, pooler_output)
    return pooled               # forward() default returns pooler_output


if __name__ == "__main__":
    key = jax.random.PRNGKey(0)
    pkey, ikey = jax.random.split(key)
    params = init_params(pkey)

    input_ids = jax.random.randint(ikey, (BATCH, SEQ), 0, VOCAB, dtype=jnp.int32)
    attention_mask = jnp.ones((BATCH, SEQ), dtype=jnp.int32)

    fwd = jax.jit(lambda p, ids, m: minilm_forward(p, ids, m))
    pooled = fwd(params, input_ids, attention_mask)
    jax.block_until_ready(pooled)

    assert pooled.shape == (BATCH, HIDDEN), pooled.shape
    assert pooled.dtype == jnp.float32
    print("KERNEL_OK")
</pallas_src>

<mosaic_0001>
module attributes {stable_mosaic.version = 11 : i64} {
  func.func @_encoder_kernel(%arg0: i32, %arg1: memref<16x32xf32, #tpu.memory_space<vmem>>, %arg2: memref<16x32xf32, #tpu.memory_space<vmem>>, %arg3: memref<2x32xf32, #tpu.memory_space<vmem>>, %arg4: memref<2x8xf32, #tpu.memory_space<vmem>>, %arg5: memref<1x32xf32, #tpu.memory_space<vmem>>, %arg6: memref<1x32xf32, #tpu.memory_space<vmem>>, %arg7: memref<2x32x96xf32, #tpu.memory_space<vmem>>, %arg8: memref<2x1x96xf32, #tpu.memory_space<vmem>>, %arg9: memref<2x32x32xf32, #tpu.memory_space<vmem>>, %arg10: memref<2x1x32xf32, #tpu.memory_space<vmem>>, %arg11: memref<2x1x32xf32, #tpu.memory_space<vmem>>, %arg12: memref<2x1x32xf32, #tpu.memory_space<vmem>>, %arg13: memref<2x32x64xf32, #tpu.memory_space<vmem>>, %arg14: memref<2x1x64xf32, #tpu.memory_space<vmem>>, %arg15: memref<2x64x32xf32, #tpu.memory_space<vmem>>, %arg16: memref<2x1x32xf32, #tpu.memory_space<vmem>>, %arg17: memref<2x1x32xf32, #tpu.memory_space<vmem>>, %arg18: memref<2x1x32xf32, #tpu.memory_space<vmem>>, %arg19: memref<32x32xf32, #tpu.memory_space<vmem>>, %arg20: memref<1x32xf32, #tpu.memory_space<vmem>>, %arg21: memref<2x256xf32, #tpu.memory_space<vmem>>, %arg22: memref<2x128xf32, #tpu.memory_space<vmem>>) attributes {dimension_semantics = [#tpu.dimension_semantics<arbitrary>], iteration_bounds = array<i64: 1>, scalar_prefetch = 0 : i64, scratch_operands = 0 : i64, tpu.core_type = #tpu.core_type<tc>, window_params = [{pipeline_mode = #tpu.pipeline_mode<synchronous>, transform_indices = @transform_0, window_bounds = array<i64: 16, 32>}, {pipeline_mode = #tpu.pipeline_mode<synchronous>, transform_indices = @transform_1, window_bounds = array<i64: 16, 32>}, {pipeline_mode = #tpu.pipeline_mode<synchronous>, transform_indices = @transform_2, window_bounds = array<i64: 2, 32>}, {pipeline_mode = #tpu.pipeline_mode<synchronous>, transform_indices = @transform_3, window_bounds = array<i64: 2, 8>}, {pipeline_mode = #tpu.pipeline_mode<synchronous>, transform_indices = @transform_4, window_bounds = array<i64: 1, 32>}, {pipeline_mode = #tpu.pipeline_mode<synchronous>, transform_indices = @transform_5, window_bounds = array<i64: 1, 32>}, {pipeline_mode = #tpu.pipeline_mode<synchronous>, transform_indices = @transform_6, window_bounds = array<i64: 2, 32, 96>}, {pipeline_mode = #tpu.pipeline_mode<synchronous>, transform_indices = @transform_7, window_bounds = array<i64: 2, 1, 96>}, {pipeline_mode = #tpu.pipeline_mode<synchronous>, transform_indices = @transform_8, window_bounds = array<i64: 2, 32, 32>}, {pipeline_mode = #tpu.pipeline_mode<synchronous>, transform_indices = @transform_9, window_bounds = array<i64: 2, 1, 32>}, {pipeline_mode = #tpu.pipeline_mode<synchronous>, transform_indices = @transform_10, window_bounds = array<i64: 2, 1, 32>}, {pipeline_mode = #tpu.pipeline_mode<synchronous>, transform_indices = @transform_11, window_bounds = array<i64: 2, 1, 32>}, {pipeline_mode = #tpu.pipeline_mode<synchronous>, transform_indices = @transform_12, window_bounds = array<i64: 2, 32, 64>}, {pipeline_mode = #tpu.pipeline_mode<synchronous>, transform_indices = @transform_13, window_bounds = array<i64: 2, 1, 64>}, {pipeline_mode = #tpu.pipeline_mode<synchronous>, transform_indices = @transform_14, window_bounds = array<i64: 2, 64, 32>}, {pipeline_mode = #tpu.pipeline_mode<synchronous>, transform_indices = @transform_15, window_bounds = array<i64: 2, 1, 32>}, {pipeline_mode = #tpu.pipeline_mode<synchronous>, transform_indices = @transform_16, window_bounds = array<i64: 2, 1, 32>}, {pipeline_mode = #tpu.pipeline_mode<synchronous>, transform_indices = @transform_17, window_bounds = array<i64: 2, 1, 32>}, {pipeline_mode = #tpu.pipeline_mode<synchronous>, transform_indices = @transform_18, window_bounds = array<i64: 32, 32>}, {pipeline_mode = #tpu.pipeline_mode<synchronous>, transform_indices = @transform_19, window_bounds = array<i64: 1, 32>}, {pipeline_mode = #tpu.pipeline_mode<synchronous>, transform_indices = @transform_20, window_bounds = array<i64: 2, 256>}, {pipeline_mode = #tpu.pipeline_mode<synchronous>, transform_indices = @transform_21, window_bounds = array<i64: 2, 128>}]} {
    %c0 = arith.constant 0 : index
    %c0_0 = arith.constant 0 : index
    %0 = vector.load %arg2[%c0, %c0_0] : memref<16x32xf32, #tpu.memory_space<vmem>>, vector<8x32xf32>
    %1 = tpu.concatenate %0, %0 in 0 : vector<8x32xf32>, vector<8x32xf32> -> vector<16x32xf32>
    %c0_1 = arith.constant 0 : index
    %c0_2 = arith.constant 0 : index
    %2 = vector.load %arg1[%c0_1, %c0_2] : memref<16x32xf32, #tpu.memory_space<vmem>>, vector<16x32xf32>
    %3 = arith.addf %2, %1 : vector<16x32xf32>
    %c0_3 = arith.constant 0 : index
    %c0_4 = arith.constant 0 : index
    %4 = vector.load %arg3[%c0_3, %c0_4] : memref<2x32xf32, #tpu.memory_space<vmem>>, vector<1x32xf32>
    %5 = vector.broadcast %4 : vector<1x32xf32> to vector<16x32xf32>
    %6 = arith.addf %3, %5 : vector<16x32xf32>
    %c0_5 = arith.constant 0 : index
    %c0_6 = arith.constant 0 : index
    %7 = vector.load %arg5[%c0_5, %c0_6] : memref<1x32xf32, #tpu.memory_space<vmem>>, vector<1x32xf32>
    %c0_7 = arith.constant 0 : index
    %c0_8 = arith.constant 0 : index
    %8 = vector.load %arg6[%c0_7, %c0_8] : memref<1x32xf32, #tpu.memory_space<vmem>>, vector<1x32xf32>
    %cst = arith.constant dense<0.000000e+00> : vector<16xf32>
    %9 = vector.multi_reduction <add>, %6, %cst [1] : vector<16x32xf32> to vector<16xf32>
    %10 = vector.shape_cast %9 : vector<16xf32> to vector<16x1xf32>
    %cst_9 = arith.constant 3.200000e+01 : f32
    %11 = vector.broadcast %cst_9 : f32 to vector<16x1xf32>
    %12 = arith.divf %10, %11 : vector<16x1xf32>
    %13 = vector.broadcast %12 : vector<16x1xf32> to vector<16x32xf32>
    %14 = arith.subf %6, %13 : vector<16x32xf32>
    %15 = arith.mulf %14, %14 : vector<16x32xf32>
    %cst_10 = arith.constant dense<0.000000e+00> : vector<16xf32>
    %16 = vector.multi_reduction <add>, %15, %cst_10 [1] : vector<16x32xf32> to vector<16xf32>
    %17 = vector.shape_cast %16 : vector<16xf32> to vector<16x1xf32>
    %cst_11 = arith.constant 3.200000e+01 : f32
    %18 = vector.broadcast %cst_11 : f32 to vector<16x1xf32>
    %19 = arith.divf %17, %18 : vector<16x1xf32>
    %20 = vector.broadcast %12 : vector<16x1xf32> to vector<16x32xf32>
    %21 = arith.subf %6, %20 : vector<16x32xf32>
    %cst_12 = arith.constant 9.99999996E-13 : f32
    %22 = vector.broadcast %cst_12 : f32 to vector<16x1xf32>
    %23 = arith.addf %19, %22 : vector<16x1xf32>
    %24 = math.rsqrt %23 : vector<16x1xf32>
    %25 = vector.broadcast %24 : vector<16x1xf32> to vector<16x32xf32>
    %26 = arith.mulf %21, %25 : vector<16x32xf32>
    %27 = vector.broadcast %7 : vector<1x32xf32> to vector<16x32xf32>
    %28 = arith.mulf %26, %27 : vector<16x32xf32>
    %29 = vector.broadcast %8 : vector<1x32xf32> to vector<16x32xf32>
    %30 = arith.addf %28, %29 : vector<16x32xf32>
    %c0_13 = arith.constant 0 : index
    %c0_14 = arith.constant 0 : index
    %31 = vector.load %arg4[%c0_13, %c0_14] : memref<2x8xf32, #tpu.memory_space<vmem>>, vector<2x8xf32>
    %cst_15 = arith.constant 1.000000e+00 : f32
    %32 = vector.broadcast %cst_15 : f32 to vector<2x8xf32>
    %33 = arith.subf %32, %31 : vector<2x8xf32>
    %cst_16 = arith.constant -1.000000e+09 : f32
    %34 = vector.broadcast %cst_16 : f32 to vector<2x8xf32>
    %35 = arith.mulf %33, %34 : vector<2x8xf32>
    %36 = vector.extract_strided_slice %35 {offsets = [0, 0], sizes = [1, 8], strides = [1, 1]} : vector<2x8xf32> to vector<1x8xf32>
    %37 = vector.shape_cast %36 : vector<1x8xf32> to vector<1x1x8xf32>
    %38 = vector.shape_cast %37 : vector<1x1x8xf32> to vector<1x1x8xf32>
    %39 = vector.broadcast %38 : vector<1x1x8xf32> to vector<4x1x8xf32>
    %40 = vector.extract_strided_slice %35 {offsets = [1, 0], sizes = [1, 8], strides = [1, 1]} : vector<2x8xf32> to vector<1x8xf32>
    %41 = vector.shape_cast %40 : vector<1x8xf32> to vector<1x1x8xf32>
    %42 = vector.shape_cast %41 : vector<1x1x8xf32> to vector<1x1x8xf32>
    %43 = vector.broadcast %42 : vector<1x1x8xf32> to vector<4x1x8xf32>
    %44 = tpu.concatenate %39, %43 in 0 : vector<4x1x8xf32>, vector<4x1x8xf32> -> vector<8x1x8xf32>
    %c0_17 = arith.constant 0 : index
    %c0_18 = arith.constant 0 : index
    %c0_19 = arith.constant 0 : index
    %45 = vector.load %arg7[%c0_17, %c0_18, %c0_19] : memref<2x32x96xf32, #tpu.memory_space<vmem>>, vector<1x32x96xf32>
    %46 = vector.shape_cast %45 : vector<1x32x96xf32> to vector<32x96xf32>
    %cst_20 = arith.constant dense<0.000000e+00> : vector<16x96xf32>
    %47 = tpu.matmul %30, %46, %cst_20 {dimension_numbers = #tpu.dot_dimension_numbers<[1], [0], [0], [1], [0, 0, 1, 1], [], []>} : vector<16x32xf32>, vector<32x96xf32>, vector<16x96xf32> -> vector<16x96xf32>
    %c0_21 = arith.constant 0 : index
    %c0_22 = arith.constant 0 : index
    %c0_23 = arith.constant 0 : index
    %48 = vector.load %arg8[%c0_21, %c0_22, %c0_23] : memref<2x1x96xf32, #tpu.memory_space<vmem>>, vector<1x1x96xf32>
    %49 = vector.shape_cast %48 : vector<1x1x96xf32> to vector<1x96xf32>
    %50 = vector.broadcast %49 : vector<1x96xf32> to vector<16x96xf32>
    %51 = arith.addf %47, %50 : vector<16x96xf32>
    %52 = vector.extract_strided_slice %51 {offsets = [0, 0], sizes = [8, 8], strides = [1, 1]} : vector<16x96xf32> to vector<8x8xf32>
    %53 = vector.extract_strided_slice %51 {offsets = [0, 8], sizes = [8, 8], strides = [1, 1]} : vector<16x96xf32> to vector<8x8xf32>
    %54 = vector.extract_strided_slice %51 {offsets = [0, 16], sizes = [8, 8], strides = [1, 1]} : vector<16x96xf32> to vector<8x8xf32>
    %55 = vector.extract_strided_slice %51 {offsets = [0, 24], sizes = [8, 8], strides = [1, 1]} : vector<16x96xf32> to vector<8x8xf32>
    %56 = vector.extract_strided_slice %51 {offsets = [8, 0], sizes = [8, 8], strides = [1, 1]} : vector<16x96xf32> to vector<8x8xf32>
    %57 = vector.extract_strided_slice %51 {offsets = [8, 8], sizes = [8, 8], strides = [1, 1]} : vector<16x96xf32> to vector<8x8xf32>
    %58 = vector.extract_strided_slice %51 {offsets = [8, 16], sizes = [8, 8], strides = [1, 1]} : vector<16x96xf32> to vector<8x8xf32>
    %59 = vector.extract_strided_slice %51 {offsets = [8, 24], sizes = [8, 8], strides = [1, 1]} : vector<16x96xf32> to vector<8x8xf32>
    %60 = vector.shape_cast %52 : vector<8x8xf32> to vector<1x8x8xf32>
    %61 = vector.shape_cast %53 : vector<8x8xf32> to vector<1x8x8xf32>
    %62 = vector.shape_cast %54 : vector<8x8xf32> to vector<1x8x8xf32>
    %63 = vector.shape_cast %55 : vector<8x8xf32> to vector<1x8x8xf32>
    %64 = vector.shape_cast %56 : vector<8x8xf32> to vector<1x8x8xf32>
    %65 = vector.shape_cast %57 : vector<8x8xf32> to vector<1x8x8xf32>
    %66 = vector.shape_cast %58 : vector<8x8xf32> to vector<1x8x8xf32>
    %67 = vector.shape_cast %59 : vector<8x8xf32> to vector<1x8x8xf32>
    %68 = tpu.concatenate %60, %61, %62, %63, %64, %65, %66, %67 in 0 : vector<1x8x8xf32>, vector<1x8x8xf32>, vector<1x8x8xf32>, vector<1x8x8xf32>, vector<1x8x8xf32>, vector<1x8x8xf32>, vector<1x8x8xf32>, vector<1x8x8xf32> -> vector<8x8x8xf32>
    %69 = vector.extract_strided_slice %51 {offsets = [0, 32], sizes = [8, 8], strides = [1, 1]} : vector<16x96xf32> to vector<8x8xf32>
    %70 = vector.extract_strided_slice %51 {offsets = [0, 40], sizes = [8, 8], strides = [1, 1]} : vector<16x96xf32> to vector<8x8xf32>
    %71 = vector.extract_strided_slice %51 {offsets = [0, 48], sizes = [8, 8], strides = [1, 1]} : vector<16x96xf32> to vector<8x8xf32>
    %72 = vector.extract_strided_slice %51 {offsets = [0, 56], sizes = [8, 8], strides = [1, 1]} : vector<16x96xf32> to vector<8x8xf32>
    %73 = vector.extract_strided_slice %51 {offsets = [8, 32], sizes = [8, 8], strides = [1, 1]} : vector<16x96xf32> to vector<8x8xf32>
    %74 = vector.extract_strided_slice %51 {offsets = [8, 40], sizes = [8, 8], strides = [1, 1]} : vector<16x96xf32> to vector<8x8xf32>
    %75 = vector.extract_strided_slice %51 {offsets = [8, 48], sizes = [8, 8], strides = [1, 1]} : vector<16x96xf32> to vector<8x8xf32>
    %76 = vector.extract_strided_slice %51 {offsets = [8, 56], sizes = [8, 8], strides = [1, 1]} : vector<16x96xf32> to vector<8x8xf32>
    %77 = vector.shape_cast %69 : vector<8x8xf32> to vector<1x8x8xf32>
    %78 = vector.shape_cast %70 : vector<8x8xf32> to vector<1x8x8xf32>
    %79 = vector.shape_cast %71 : vector<8x8xf32> to vector<1x8x8xf32>
    %80 = vector.shape_cast %72 : vector<8x8xf32> to vector<1x8x8xf32>
    %81 = vector.shape_cast %73 : vector<8x8xf32> to vector<1x8x8xf32>
    %82 = vector.shape_cast %74 : vector<8x8xf32> to vector<1x8x8xf32>
    %83 = vector.shape_cast %75 : vector<8x8xf32> to vector<1x8x8xf32>
    %84 = vector.shape_cast %76 : vector<8x8xf32> to vector<1x8x8xf32>
    %85 = tpu.concatenate %77, %78, %79, %80, %81, %82, %83, %84 in 0 : vector<1x8x8xf32>, vector<1x8x8xf32>, vector<1x8x8xf32>, vector<1x8x8xf32>, vector<1x8x8xf32>, vector<1x8x8xf32>, vector<1x8x8xf32>, vector<1x8x8xf32> -> vector<8x8x8xf32>
    %86 = vector.extract_strided_slice %51 {offsets = [0, 64], sizes = [8, 8], strides = [1, 1]} : vector<16x96xf32> to vector<8x8xf32>
    %87 = vector.extract_strided_slice %51 {offsets = [0, 72], sizes = [8, 8], strides = [1, 1]} : vector<16x96xf32> to vector<8x8xf32>
    %88 = vector.extract_strided_slice %51 {offsets = [0, 80], sizes = [8, 8], strides = [1, 1]} : vector<16x96xf32> to vector<8x8xf32>
    %89 = vector.extract_strided_slice %51 {offsets = [0, 88], sizes = [8, 8], strides = [1, 1]} : vector<16x96xf32> to vector<8x8xf32>
    %90 = vector.extract_strided_slice %51 {offsets = [8, 64], sizes = [8, 8], strides = [1, 1]} : vector<16x96xf32> to vector<8x8xf32>
    %91 = vector.extract_strided_slice %51 {offsets = [8, 72], sizes = [8, 8], strides = [1, 1]} : vector<16x96xf32> to vector<8x8xf32>
    %92 = vector.extract_strided_slice %51 {offsets = [8, 80], sizes = [8, 8], strides = [1, 1]} : vector<16x96xf32> to vector<8x8xf32>
    %93 = vector.extract_strided_slice %51 {offsets = [8, 88], sizes = [8, 8], strides = [1, 1]} : vector<16x96xf32> to vector<8x8xf32>
    %94 = vector.shape_cast %86 : vector<8x8xf32> to vector<1x8x8xf32>
    %95 = vector.shape_cast %87 : vector<8x8xf32> to vector<1x8x8xf32>
    %96 = vector.shape_cast %88 : vector<8x8xf32> to vector<1x8x8xf32>
    %97 = vector.shape_cast %89 : vector<8x8xf32> to vector<1x8x8xf32>
    %98 = vector.shape_cast %90 : vector<8x8xf32> to vector<1x8x8xf32>
    %99 = vector.shape_cast %91 : vector<8x8xf32> to vector<1x8x8xf32>
    %100 = vector.shape_cast %92 : vector<8x8xf32> to vector<1x8x8xf32>
    %101 = vector.shape_cast %93 : vector<8x8xf32> to vector<1x8x8xf32>
    %102 = tpu.concatenate %94, %95, %96, %97, %98, %99, %100, %101 in 0 : vector<1x8x8xf32>, vector<1x8x8xf32>, vector<1x8x8xf32>, vector<1x8x8xf32>, vector<1x8x8xf32>, vector<1x8x8xf32>, vector<1x8x8xf32>, vector<1x8x8xf32> -> vector<8x8x8xf32>
    "tpu.trace_start"() <{level = 10 : i32, message = "nqd,nkd->nqk"}> : () -> ()
    %cst_24 = arith.constant dense<0.000000e+00> : vector<8x8x8xf32>
    %103 = tpu.matmul %68, %85, %cst_24 {dimension_numbers = #tpu.dot_dimension_numbers<[2], [2], [1], [1], [0, 0, 0, 1, 1, 1], [0], [0]>} : vector<8x8x8xf32>, vector<8x8x8xf32>, vector<8x8x8xf32> -> vector<8x8x8xf32>
    "tpu.trace_stop"() : () -> ()
    %104 = vector.broadcast %44 : vector<8x1x8xf32> to vector<8x8x8xf32>
    %105 = arith.addf %103, %104 : vector<8x8x8xf32>
    %cst_25 = arith.constant dense<0xFF800000> : vector<8x8xf32>
    %106 = vector.multi_reduction <maximumf>, %105, %cst_25 [2] : vector<8x8x8xf32> to vector<8x8xf32>
    %107 = vector.shape_cast %106 : vector<8x8xf32> to vector<8x8x1xf32>
    %108 = vector.broadcast %107 : vector<8x8x1xf32> to vector<8x8x8xf32>
    %109 = arith.subf %105, %108 : vector<8x8x8xf32>
    %110 = math.exp %109 : vector<8x8x8xf32>
    %cst_26 = arith.constant dense<0.000000e+00> : vector<8x8xf32>
    %111 = vector.multi_reduction <add>, %110, %cst_26 [2] : vector<8x8x8xf32> to vector<8x8xf32>
    %112 = vector.shape_cast %111 : vector<8x8xf32> to vector<8x8x1xf32>
    %113 = tpu.reciprocal %112 {approx = true} : vector<8x8x1xf32> -> vector<8x8x1xf32>
    %114 = vector.broadcast %113 : vector<8x8x1xf32> to vector<8x8x8xf32>
    %115 = arith.mulf %110, %114 : vector<8x8x8xf32>
    "tpu.trace_start"() <{level = 10 : i32, message = "nqk,nkd->nqd"}> : () -> ()
    %cst_27 = arith.constant dense<0.000000e+00> : vector<8x8x8xf32>
    %116 = tpu.matmul %115, %102, %cst_27 {dimension_numbers = #tpu.dot_dimension_numbers<[2], [1], [1], [2], [0, 0, 0, 1, 1, 2], [0], [0]>} : vector<8x8x8xf32>, vector<8x8x8xf32>, vector<8x8x8xf32> -> vector<8x8x8xf32>
    "tpu.trace_stop"() : () -> ()
    %117 = vector.extract_strided_slice %116 {offsets = [0, 0, 0], sizes = [1, 8, 8], strides = [1, 1, 1]} : vector<8x8x8xf32> to vector<1x8x8xf32>
    %118 = vector.shape_cast %117 : vector<1x8x8xf32> to vector<8x8xf32>
    %119 = vector.extract_strided_slice %116 {offsets = [1, 0, 0], sizes = [1, 8, 8], strides = [1, 1, 1]} : vector<8x8x8xf32> to vector<1x8x8xf32>
    %120 = vector.shape_cast %119 : vector<1x8x8xf32> to vector<8x8xf32>
    %121 = vector.extract_strided_slice %116 {offsets = [2, 0, 0], sizes = [1, 8, 8], strides = [1, 1, 1]} : vector<8x8x8xf32> to vector<1x8x8xf32>
    %122 = vector.shape_cast %121 : vector<1x8x8xf32> to vector<8x8xf32>
    %123 = vector.extract_strided_slice %116 {offsets = [3, 0, 0], sizes = [1, 8, 8], strides = [1, 1, 1]} : vector<8x8x8xf32> to vector<1x8x8xf32>
    %124 = vector.shape_cast %123 : vector<1x8x8xf32> to vector<8x8xf32>
    %125 = tpu.concatenate %118, %120, %122, %124 in 1 : vector<8x8xf32>, vector<8x8xf32>, vector<8x8xf32>, vector<8x8xf32> -> vector<8x32xf32>
    %126 = vector.extract_strided_slice %116 {offsets = [4, 0, 0], sizes = [1, 8, 8], strides = [1, 1, 1]} : vector<8x8x8xf32> to vector<1x8x8xf32>
    %127 = vector.shape_cast %126 : vector<1x8x8xf32> to vector<8x8xf32>
    %128 = vector.extract_strided_slice %116 {offsets = [5, 0, 0], sizes = [1, 8, 8], strides = [1, 1, 1]} : vector<8x8x8xf32> to vector<1x8x8xf32>
    %129 = vector.shape_cast %128 : vector<1x8x8xf32> to vector<8x8xf32>
    %130 = vector.extract_strided_slice %116 {offsets = [6, 0, 0], sizes = [1, 8, 8], strides = [1, 1, 1]} : vector<8x8x8xf32> to vector<1x8x8xf32>
    %131 = vector.shape_cast %130 : vector<1x8x8xf32> to vector<8x8xf32>
    %132 = vector.extract_strided_slice %116 {offsets = [7, 0, 0], sizes = [1, 8, 8], strides = [1, 1, 1]} : vector<8x8x8xf32> to vector<1x8x8xf32>
    %133 = vector.shape_cast %132 : vector<1x8x8xf32> to vector<8x8xf32>
    %134 = tpu.concatenate %127, %129, %131, %133 in 1 : vector<8x8xf32>, vector<8x8xf32>, vector<8x8xf32>, vector<8x8xf32> -> vector<8x32xf32>
    %135 = tpu.concatenate %125, %134 in 0 : vector<8x32xf32>, vector<8x32xf32> -> vector<16x32xf32>
    %c0_28 = arith.constant 0 : index
    %c0_29 = arith.constant 0 : index
    %c0_30 = arith.constant 0 : index
    %136 = vector.load %arg9[%c0_28, %c0_29, %c0_30] : memref<2x32x32xf32, #tpu.memory_space<vmem>>, vector<1x32x32xf32>
    %137 = vector.shape_cast %136 : vector<1x32x32xf32> to vector<32x32xf32>
    %cst_31 = arith.constant dense<0.000000e+00> : vector<16x32xf32>
    %138 = tpu.matmul %135, %137, %cst_31 {dimension_numbers = #tpu.dot_dimension_numbers<[1], [0], [0], [1], [0, 0, 1, 1], [], []>} : vector<16x32xf32>, vector<32x32xf32>, vector<16x32xf32> -> vector<16x32xf32>
    %c0_32 = arith.constant 0 : index
    %c0_33 = arith.constant 0 : index
    %c0_34 = arith.constant 0 : index
    %139 = vector.load %arg10[%c0_32, %c0_33, %c0_34] : memref<2x1x32xf32, #tpu.memory_space<vmem>>, vector<1x1x32xf32>
    %140 = vector.shape_cast %139 : vector<1x1x32xf32> to vector<1x32xf32>
    %141 = vector.broadcast %140 : vector<1x32xf32> to vector<16x32xf32>
    %142 = arith.addf %138, %141 : vector<16x32xf32>
    %143 = arith.addf %142, %30 : vector<16x32xf32>
    %c0_35 = arith.constant 0 : index
    %c0_36 = arith.constant 0 : index
    %c0_37 = arith.constant 0 : index
    %144 = vector.load %arg11[%c0_35, %c0_36, %c0_37] : memref<2x1x32xf32, #tpu.memory_space<vmem>>, vector<1x1x32xf32>
    %145 = vector.shape_cast %144 : vector<1x1x32xf32> to vector<1x32xf32>
    %c0_38 = arith.constant 0 : index
    %c0_39 = arith.constant 0 : index
    %c0_40 = arith.constant 0 : index
    %146 = vector.load %arg12[%c0_38, %c0_39, %c0_40] : memref<2x1x32xf32, #tpu.memory_space<vmem>>, vector<1x1x32xf32>
    %147 = vector.shape_cast %146 : vector<1x1x32xf32> to vector<1x32xf32>
    %cst_41 = arith.constant dense<0.000000e+00> : vector<16xf32>
    %148 = vector.multi_reduction <add>, %143, %cst_41 [1] : vector<16x32xf32> to vector<16xf32>
    %149 = vector.shape_cast %148 : vector<16xf32> to vector<16x1xf32>
    %cst_42 = arith.constant 3.200000e+01 : f32
    %150 = vector.broadcast %cst_42 : f32 to vector<16x1xf32>
    %151 = arith.divf %149, %150 : vector<16x1xf32>
    %152 = vector.broadcast %151 : vector<16x1xf32> to vector<16x32xf32>
    %153 = arith.subf %143, %152 : vector<16x32xf32>
    %154 = arith.mulf %153, %153 : vector<16x32xf32>
    %cst_43 = arith.constant dense<0.000000e+00> : vector<16xf32>
    %155 = vector.multi_reduction <add>, %154, %cst_43 [1] : vector<16x32xf32> to vector<16xf32>
    %156 = vector.shape_cast %155 : vector<16xf32> to vector<16x1xf32>
    %cst_44 = arith.constant 3.200000e+01 : f32
    %157 = vector.broadcast %cst_44 : f32 to vector<16x1xf32>
    %158 = arith.divf %156, %157 : vector<16x1xf32>
    %159 = vector.broadcast %151 : vector<16x1xf32> to vector<16x32xf32>
    %160 = arith.subf %143, %159 : vector<16x32xf32>
    %cst_45 = arith.constant 9.99999996E-13 : f32
    %161 = vector.broadcast %cst_45 : f32 to vector<16x1xf32>
    %162 = arith.addf %158, %161 : vector<16x1xf32>
    %163 = math.rsqrt %162 : vector<16x1xf32>
    %164 = vector.broadcast %163 : vector<16x1xf32> to vector<16x32xf32>
    %165 = arith.mulf %160, %164 : vector<16x32xf32>
    %166 = vector.broadcast %145 : vector<1x32xf32> to vector<16x32xf32>
    %167 = arith.mulf %165, %166 : vector<16x32xf32>
    %168 = vector.broadcast %147 : vector<1x32xf32> to vector<16x32xf32>
    %169 = arith.addf %167, %168 : vector<16x32xf32>
    %c0_46 = arith.constant 0 : index
    %c0_47 = arith.constant 0 : index
    %c0_48 = arith.constant 0 : index
    %170 = vector.load %arg13[%c0_46, %c0_47, %c0_48] : memref<2x32x64xf32, #tpu.memory_space<vmem>>, vector<1x32x64xf32>
    %171 = vector.shape_cast %170 : vector<1x32x64xf32> to vector<32x64xf32>
    %cst_49 = arith.constant dense<0.000000e+00> : vector<16x64xf32>
    %172 = tpu.matmul %169, %171, %cst_49 {dimension_numbers = #tpu.dot_dimension_numbers<[1], [0], [0], [1], [0, 0, 1, 1], [], []>} : vector<16x32xf32>, vector<32x64xf32>, vector<16x64xf32> -> vector<16x64xf32>
    %c0_50 = arith.constant 0 : index
    %c0_51 = arith.constant 0 : index
    %c0_52 = arith.constant 0 : index
    %173 = vector.load %arg14[%c0_50, %c0_51, %c0_52] : memref<2x1x64xf32, #tpu.memory_space<vmem>>, vector<1x1x64xf32>
    %174 = vector.shape_cast %173 : vector<1x1x64xf32> to vector<1x64xf32>
    %175 = vector.broadcast %174 : vector<1x64xf32> to vector<16x64xf32>
    %176 = arith.addf %172, %175 : vector<16x64xf32>
    %cst_53 = arith.constant 0.636619746 : f32
    %177 = math.sqrt %cst_53 : f32
    %cst_54 = arith.constant 5.000000e-01 : f32
    %178 = vector.broadcast %cst_54 : f32 to vector<16x64xf32>
    %179 = arith.mulf %178, %176 : vector<16x64xf32>
    %cst_55 = arith.constant 4.471500e-02 : f32
    %180 = vector.broadcast %cst_55 : f32 to vector<16x64xf32>
    %181 = arith.mulf %180, %176 : vector<16x64xf32>
    %182 = arith.mulf %181, %176 : vector<16x64xf32>
    %183 = arith.mulf %182, %176 : vector<16x64xf32>
    %184 = arith.addf %176, %183 : vector<16x64xf32>
    %185 = vector.broadcast %177 : f32 to vector<16x64xf32>
    %186 = arith.mulf %185, %184 : vector<16x64xf32>
    %187 = math.tanh %186 : vector<16x64xf32>
    %cst_56 = arith.constant 1.000000e+00 : f32
    %188 = vector.broadcast %cst_56 : f32 to vector<16x64xf32>
    %189 = arith.addf %188, %187 : vector<16x64xf32>
    %190 = arith.mulf %179, %189 : vector<16x64xf32>
    %c0_57 = arith.constant 0 : index
    %c0_58 = arith.constant 0 : index
    %c0_59 = arith.constant 0 : index
    %191 = vector.load %arg15[%c0_57, %c0_58, %c0_59] : memref<2x64x32xf32, #tpu.memory_space<vmem>>, vector<1x64x32xf32>
    %192 = vector.shape_cast %191 : vector<1x64x32xf32> to vector<64x32xf32>
    %cst_60 = arith.constant dense<0.000000e+00> : vector<16x32xf32>
    %193 = tpu.matmul %190, %192, %cst_60 {dimension_numbers = #tpu.dot_dimension_numbers<[1], [0], [0], [1], [0, 0, 1, 1], [], []>} : vector<16x64xf32>, vector<64x32xf32>, vector<16x32xf32> -> vector<16x32xf32>
    %c0_61 = arith.constant 0 : index
    %c0_62 = arith.constant 0 : index
    %c0_63 = arith.constant 0 : index
    %194 = vector.load %arg16[%c0_61, %c0_62, %c0_63] : memref<2x1x32xf32, #tpu.memory_space<vmem>>, vector<1x1x32xf32>
    %195 = vector.shape_cast %194 : vector<1x1x32xf32> to vector<1x32xf32>
    %196 = vector.broadcast %195 : vector<1x32xf32> to vector<16x32xf32>
    %197 = arith.addf %193, %196 : vector<16x32xf32>
    %198 = arith.addf %197, %169 : vector<16x32xf32>
    %c0_64 = arith.constant 0 : index
    %c0_65 = arith.constant 0 : index
    %c0_66 = arith.constant 0 : index
    %199 = vector.load %arg17[%c0_64, %c0_65, %c0_66] : memref<2x1x32xf32, #tpu.memory_space<vmem>>, vector<1x1x32xf32>
    %200 = vector.shape_cast %199 : vector<1x1x32xf32> to vector<1x32xf32>
    %c0_67 = arith.constant 0 : index
    %c0_68 = arith.constant 0 : index
    %c0_69 = arith.constant 0 : index
    %201 = vector.load %arg18[%c0_67, %c0_68, %c0_69] : memref<2x1x32xf32, #tpu.memory_space<vmem>>, vector<1x1x32xf32>
    %202 = vector.shape_cast %201 : vector<1x1x32xf32> to vector<1x32xf32>
    %cst_70 = arith.constant dense<0.000000e+00> : vector<16xf32>
    %203 = vector.multi_reduction <add>, %198, %cst_70 [1] : vector<16x32xf32> to vector<16xf32>
    %204 = vector.shape_cast %203 : vector<16xf32> to vector<16x1xf32>
    %cst_71 = arith.constant 3.200000e+01 : f32
    %205 = vector.broadcast %cst_71 : f32 to vector<16x1xf32>
    %206 = arith.divf %204, %205 : vector<16x1xf32>
    %207 = vector.broadcast %206 : vector<16x1xf32> to vector<16x32xf32>
    %208 = arith.subf %198, %207 : vector<16x32xf32>
    %209 = arith.mulf %208, %208 : vector<16x32xf32>
    %cst_72 = arith.constant dense<0.000000e+00> : vector<16xf32>
    %210 = vector.multi_reduction <add>, %209, %cst_72 [1] : vector<16x32xf32> to vector<16xf32>
    %211 = vector.shape_cast %210 : vector<16xf32> to vector<16x1xf32>
    %cst_73 = arith.constant 3.200000e+01 : f32
    %212 = vector.broadcast %cst_73 : f32 to vector<16x1xf32>
    %213 = arith.divf %211, %212 : vector<16x1xf32>
    %214 = vector.broadcast %206 : vector<16x1xf32> to vector<16x32xf32>
    %215 = arith.subf %198, %214 : vector<16x32xf32>
    %cst_74 = arith.constant 9.99999996E-13 : f32
    %216 = vector.broadcast %cst_74 : f32 to vector<16x1xf32>
    %217 = arith.addf %213, %216 : vector<16x1xf32>
    %218 = math.rsqrt %217 : vector<16x1xf32>
    %219 = vector.broadcast %218 : vector<16x1xf32> to vector<16x32xf32>
    %220 = arith.mulf %215, %219 : vector<16x32xf32>
    %221 = vector.broadcast %200 : vector<1x32xf32> to vector<16x32xf32>
    %222 = arith.mulf %220, %221 : vector<16x32xf32>
    %223 = vector.broadcast %202 : vector<1x32xf32> to vector<16x32xf32>
    %224 = arith.addf %222, %223 : vector<16x32xf32>
    %c1 = arith.constant 1 : index
    %c0_75 = arith.constant 0 : index
    %c0_76 = arith.constant 0 : index
    %225 = vector.load %arg7[%c1, %c0_75, %c0_76] : memref<2x32x96xf32, #tpu.memory_space<vmem>>, vector<1x32x96xf32>
    %226 = vector.shape_cast %225 : vector<1x32x96xf32> to vector<32x96xf32>
    %cst_77 = arith.constant dense<0.000000e+00> : vector<16x96xf32>
    %227 = tpu.matmul %224, %226, %cst_77 {dimension_numbers = #tpu.dot_dimension_numbers<[1], [0], [0], [1], [0, 0, 1, 1], [], []>} : vector<16x32xf32>, vector<32x96xf32>, vector<16x96xf32> -> vector<16x96xf32>
    %c1_78 = arith.constant 1 : index
    %c0_79 = arith.constant 0 : index
    %c0_80 = arith.constant 0 : index
    %228 = vector.load %arg8[%c1_78, %c0_79, %c0_80] : memref<2x1x96xf32, #tpu.memory_space<vmem>>, vector<1x1x96xf32>
    %229 = vector.shape_cast %228 : vector<1x1x96xf32> to vector<1x96xf32>
    %230 = vector.broadcast %229 : vector<1x96xf32> to vector<16x96xf32>
    %231 = arith.addf %227, %230 : vector<16x96xf32>
    %232 = vector.extract_strided_slice %231 {offsets = [0, 0], sizes = [8, 8], strides = [1, 1]} : vector<16x96xf32> to vector<8x8xf32>
    %233 = vector.extract_strided_slice %231 {offsets = [0, 8], sizes = [8, 8], strides = [1, 1]} : vector<16x96xf32> to vector<8x8xf32>
    %234 = vector.extract_strided_slice %231 {offsets = [0, 16], sizes = [8, 8], strides = [1, 1]} : vector<16x96xf32> to vector<8x8xf32>
    %235 = vector.extract_strided_slice %231 {offsets = [0, 24], sizes = [8, 8], strides = [1, 1]} : vector<16x96xf32> to vector<8x8xf32>
    %236 = vector.extract_strided_slice %231 {offsets = [8, 0], sizes = [8, 8], strides = [1, 1]} : vector<16x96xf32> to vector<8x8xf32>
    %237 = vector.extract_strided_slice %231 {offsets = [8, 8], sizes = [8, 8], strides = [1, 1]} : vector<16x96xf32> to vector<8x8xf32>
    %238 = vector.extract_strided_slice %231 {offsets = [8, 16], sizes = [8, 8], strides = [1, 1]} : vector<16x96xf32> to vector<8x8xf32>
    %239 = vector.extract_strided_slice %231 {offsets = [8, 24], sizes = [8, 8], strides = [1, 1]} : vector<16x96xf32> to vector<8x8xf32>
    %240 = vector.shape_cast %232 : vector<8x8xf32> to vector<1x8x8xf32>
    %241 = vector.shape_cast %233 : vector<8x8xf32> to vector<1x8x8xf32>
    %242 = vector.shape_cast %234 : vector<8x8xf32> to vector<1x8x8xf32>
    %243 = vector.shape_cast %235 : vector<8x8xf32> to vector<1x8x8xf32>
    %244 = vector.shape_cast %236 : vector<8x8xf32> to vector<1x8x8xf32>
    %245 = vector.shape_cast %237 : vector<8x8xf32> to vector<1x8x8xf32>
    %246 = vector.shape_cast %238 : vector<8x8xf32> to vector<1x8x8xf32>
    %247 = vector.shape_cast %239 : vector<8x8xf32> to vector<1x8x8xf32>
    %248 = tpu.concatenate %240, %241, %242, %243, %244, %245, %246, %247 in 0 : vector<1x8x8xf32>, vector<1x8x8xf32>, vector<1x8x8xf32>, vector<1x8x8xf32>, vector<1x8x8xf32>, vector<1x8x8xf32>, vector<1x8x8xf32>, vector<1x8x8xf32> -> vector<8x8x8xf32>
    %249 = vector.extract_strided_slice %231 {offsets = [0, 32], sizes = [8, 8], strides = [1, 1]} : vector<16x96xf32> to vector<8x8xf32>
    %250 = vector.extract_strided_slice %231 {offsets = [0, 40], sizes = [8, 8], strides = [1, 1]} : vector<16x96xf32> to vector<8x8xf32>
    %251 = vector.extract_strided_slice %231 {offsets = [0, 48], sizes = [8, 8], strides = [1, 1]} : vector<16x96xf32> to vector<8x8xf32>
    %252 = vector.extract_strided_slice %231 {offsets = [0, 56], sizes = [8, 8], strides = [1, 1]} : vector<16x96xf32> to vector<8x8xf32>
    %253 = vector.extract_strided_slice %231 {offsets = [8, 32], sizes = [8, 8], strides = [1, 1]} : vector<16x96xf32> to vector<8x8xf32>
    %254 = vector.extract_strided_slice %231 {offsets = [8, 40], sizes = [8, 8], strides = [1, 1]} : vector<16x96xf32> to vector<8x8xf32>
    %255 = vector.extract_strided_slice %231 {offsets = [8, 48], sizes = [8, 8], strides = [1, 1]} : vector<16x96xf32> to vector<8x8xf32>
    %256 = vector.extract_strided_slice %231 {offsets = [8, 56], sizes = [8, 8], strides = [1, 1]} : vector<16x96xf32> to vector<8x8xf32>
    %257 = vector.shape_cast %249 : vector<8x8xf32> to vector<1x8x8xf32>
    %258 = vector.shape_cast %250 : vector<8x8xf32> to vector<1x8x8xf32>
    %259 = vector.shape_cast %251 : vector<8x8xf32> to vector<1x8x8xf32>
    %260 = vector.shape_cast %252 : vector<8x8xf32> to vector<1x8x8xf32>
    %261 = vector.shape_cast %253 : vector<8x8xf32> to vector<1x8x8xf32>
    %262 = vector.shape_cast %254 : vector<8x8xf32> to vector<1x8x8xf32>
    %263 = vector.shape_cast %255 : vector<8x8xf32> to vector<1x8x8xf32>
    %264 = vector.shape_cast %256 : vector<8x8xf32> to vector<1x8x8xf32>
    %265 = tpu.concatenate %257, %258, %259, %260, %261, %262, %263, %264 in 0 : vector<1x8x8xf32>, vector<1x8x8xf32>, vector<1x8x8xf32>, vector<1x8x8xf32>, vector<1x8x8xf32>, vector<1x8x8xf32>, vector<1x8x8xf32>, vector<1x8x8xf32> -> vector<8x8x8xf32>
    %266 = vector.extract_strided_slice %231 {offsets = [0, 64], sizes = [8, 8], strides = [1, 1]} : vector<16x96xf32> to vector<8x8xf32>
    %267 = vector.extract_strided_slice %231 {offsets = [0, 72], sizes = [8, 8], strides = [1, 1]} : vector<16x96xf32> to vector<8x8xf32>
    %268 = vector.extract_strided_slice %231 {offsets = [0, 80], sizes = [8, 8], strides = [1, 1]} : vector<16x96xf32> to vector<8x8xf32>
    %269 = vector.extract_strided_slice %231 {offsets = [0, 88], sizes = [8, 8], strides = [1, 1]} : vector<16x96xf32> to vector<8x8xf32>
    %270 = vector.extract_strided_slice %231 {offsets = [8, 64], sizes = [8, 8], strides = [1, 1]} : vector<16x96xf32> to vector<8x8xf32>
    %271 = vector.extract_strided_slice %231 {offsets = [8, 72], sizes = [8, 8], strides = [1, 1]} : vector<16x96xf32> to vector<8x8xf32>
    %272 = vector.extract_strided_slice %231 {offsets = [8, 80], sizes = [8, 8], strides = [1, 1]} : vector<16x96xf32> to vector<8x8xf32>
    %273 = vector.extract_strided_slice %231 {offsets = [8, 88], sizes = [8, 8], strides = [1, 1]} : vector<16x96xf32> to vector<8x8xf32>
    %274 = vector.shape_cast %266 : vector<8x8xf32> to vector<1x8x8xf32>
    %275 = vector.shape_cast %267 : vector<8x8xf32> to vector<1x8x8xf32>
    %276 = vector.shape_cast %268 : vector<8x8xf32> to vector<1x8x8xf32>
    %277 = vector.shape_cast %269 : vector<8x8xf32> to vector<1x8x8xf32>
    %278 = vector.shape_cast %270 : vector<8x8xf32> to vector<1x8x8xf32>
    %279 = vector.shape_cast %271 : vector<8x8xf32> to vector<1x8x8xf32>
    %280 = vector.shape_cast %272 : vector<8x8xf32> to vector<1x8x8xf32>
    %281 = vector.shape_cast %273 : vector<8x8xf32> to vector<1x8x8xf32>
    %282 = tpu.concatenate %274, %275, %276, %277, %278, %279, %280, %281 in 0 : vector<1x8x8xf32>, vector<1x8x8xf32>, vector<1x8x8xf32>, vector<1x8x8xf32>, vector<1x8x8xf32>, vector<1x8x8xf32>, vector<1x8x8xf32>, vector<1x8x8xf32> -> vector<8x8x8xf32>
    "tpu.trace_start"() <{level = 10 : i32, message = "nqd,nkd->nqk"}> : () -> ()
    %cst_81 = arith.constant dense<0.000000e+00> : vector<8x8x8xf32>
    %283 = tpu.matmul %248, %265, %cst_81 {dimension_numbers = #tpu.dot_dimension_numbers<[2], [2], [1], [1], [0, 0, 0, 1, 1, 1], [0], [0]>} : vector<8x8x8xf32>, vector<8x8x8xf32>, vector<8x8x8xf32> -> vector<8x8x8xf32>
    "tpu.trace_stop"() : () -> ()
    %284 = vector.broadcast %44 : vector<8x1x8xf32> to vector<8x8x8xf32>
    %285 = arith.addf %283, %284 : vector<8x8x8xf32>
    %cst_82 = arith.constant dense<0xFF800000> : vector<8x8xf32>
    %286 = vector.multi_reduction <maximumf>, %285, %cst_82 [2] : vector<8x8x8xf32> to vector<8x8xf32>
    %287 = vector.shape_cast %286 : vector<8x8xf32> to vector<8x8x1xf32>
    %288 = vector.broadcast %287 : vector<8x8x1xf32> to vector<8x8x8xf32>
    %289 = arith.subf %285, %288 : vector<8x8x8xf32>
    %290 = math.exp %289 : vector<8x8x8xf32>
    %cst_83 = arith.constant dense<0.000000e+00> : vector<8x8xf32>
    %291 = vector.multi_reduction <add>, %290, %cst_83 [2] : vector<8x8x8xf32> to vector<8x8xf32>
    %292 = vector.shape_cast %291 : vector<8x8xf32> to vector<8x8x1xf32>
    %293 = tpu.reciprocal %292 {approx = true} : vector<8x8x1xf32> -> vector<8x8x1xf32>
    %294 = vector.broadcast %293 : vector<8x8x1xf32> to vector<8x8x8xf32>
    %295 = arith.mulf %290, %294 : vector<8x8x8xf32>
    "tpu.trace_start"() <{level = 10 : i32, message = "nqk,nkd->nqd"}> : () -> ()
    %cst_84 = arith.constant dense<0.000000e+00> : vector<8x8x8xf32>
    %296 = tpu.matmul %295, %282, %cst_84 {dimension_numbers = #tpu.dot_dimension_numbers<[2], [1], [1], [2], [0, 0, 0, 1, 1, 2], [0], [0]>} : vector<8x8x8xf32>, vector<8x8x8xf32>, vector<8x8x8xf32> -> vector<8x8x8xf32>
    "tpu.trace_stop"() : () -> ()
    %297 = vector.extract_strided_slice %296 {offsets = [0, 0, 0], sizes = [1, 8, 8], strides = [1, 1, 1]} : vector<8x8x8xf32> to vector<1x8x8xf32>
    %298 = vector.shape_cast %297 : vector<1x8x8xf32> to vector<8x8xf32>
    %299 = vector.extract_strided_slice %296 {offsets = [1, 0, 0], sizes = [1, 8, 8], strides = [1, 1, 1]} : vector<8x8x8xf32> to vector<1x8x8xf32>
    %300 = vector.shape_cast %299 : vector<1x8x8xf32> to vector<8x8xf32>
    %301 = vector.extract_strided_slice %296 {offsets = [2, 0, 0], sizes = [1, 8, 8], strides = [1, 1, 1]} : vector<8x8x8xf32> to vector<1x8x8xf32>
    %302 = vector.shape_cast %301 : vector<1x8x8xf32> to vector<8x8xf32>
    %303 = vector.extract_strided_slice %296 {offsets = [3, 0, 0], sizes = [1, 8, 8], strides = [1, 1, 1]} : vector<8x8x8xf32> to vector<1x8x8xf32>
    %304 = vector.shape_cast %303 : vector<1x8x8xf32> to vector<8x8xf32>
    %305 = tpu.concatenate %298, %300, %302, %304 in 1 : vector<8x8xf32>, vector<8x8xf32>, vector<8x8xf32>, vector<8x8xf32> -> vector<8x32xf32>
    %306 = vector.extract_strided_slice %296 {offsets = [4, 0, 0], sizes = [1, 8, 8], strides = [1, 1, 1]} : vector<8x8x8xf32> to vector<1x8x8xf32>
    %307 = vector.shape_cast %306 : vector<1x8x8xf32> to vector<8x8xf32>
    %308 = vector.extract_strided_slice %296 {offsets = [5, 0, 0], sizes = [1, 8, 8], strides = [1, 1, 1]} : vector<8x8x8xf32> to vector<1x8x8xf32>
    %309 = vector.shape_cast %308 : vector<1x8x8xf32> to vector<8x8xf32>
    %310 = vector.extract_strided_slice %296 {offsets = [6, 0, 0], sizes = [1, 8, 8], strides = [1, 1, 1]} : vector<8x8x8xf32> to vector<1x8x8xf32>
    %311 = vector.shape_cast %310 : vector<1x8x8xf32> to vector<8x8xf32>
    %312 = vector.extract_strided_slice %296 {offsets = [7, 0, 0], sizes = [1, 8, 8], strides = [1, 1, 1]} : vector<8x8x8xf32> to vector<1x8x8xf32>
    %313 = vector.shape_cast %312 : vector<1x8x8xf32> to vector<8x8xf32>
    %314 = tpu.concatenate %307, %309, %311, %313 in 1 : vector<8x8xf32>, vector<8x8xf32>, vector<8x8xf32>, vector<8x8xf32> -> vector<8x32xf32>
    %315 = tpu.concatenate %305, %314 in 0 : vector<8x32xf32>, vector<8x32xf32> -> vector<16x32xf32>
    %c1_85 = arith.constant 1 : index
    %c0_86 = arith.constant 0 : index
    %c0_87 = arith.constant 0 : index
    %316 = vector.load %arg9[%c1_85, %c0_86, %c0_87] : memref<2x32x32xf32, #tpu.memory_space<vmem>>, vector<1x32x32xf32>
    %317 = vector.shape_cast %316 : vector<1x32x32xf32> to vector<32x32xf32>
    %cst_88 = arith.constant dense<0.000000e+00> : vector<16x32xf32>
    %318 = tpu.matmul %315, %317, %cst_88 {dimension_numbers = #tpu.dot_dimension_numbers<[1], [0], [0], [1], [0, 0, 1, 1], [], []>} : vector<16x32xf32>, vector<32x32xf32>, vector<16x32xf32> -> vector<16x32xf32>
    %c1_89 = arith.constant 1 : index
    %c0_90 = arith.constant 0 : index
    %c0_91 = arith.constant 0 : index
    %319 = vector.load %arg10[%c1_89, %c0_90, %c0_91] : memref<2x1x32xf32, #tpu.memory_space<vmem>>, vector<1x1x32xf32>
    %320 = vector.shape_cast %319 : vector<1x1x32xf32> to vector<1x32xf32>
    %321 = vector.broadcast %320 : vector<1x32xf32> to vector<16x32xf32>
    %322 = arith.addf %318, %321 : vector<16x32xf32>
    %323 = arith.addf %322, %224 : vector<16x32xf32>
    %c1_92 = arith.constant 1 : index
    %c0_93 = arith.constant 0 : index
    %c0_94 = arith.constant 0 : index
    %324 = vector.load %arg11[%c1_92, %c0_93, %c0_94] : memref<2x1x32xf32, #tpu.memory_space<vmem>>, vector<1x1x32xf32>
    %325 = vector.shape_cast %324 : vector<1x1x32xf32> to vector<1x32xf32>
    %c1_95 = arith.constant 1 : index
    %c0_96 = arith.constant 0 : index
    %c0_97 = arith.constant 0 : index
    %326 = vector.load %arg12[%c1_95, %c0_96, %c0_97] : memref<2x1x32xf32, #tpu.memory_space<vmem>>, vector<1x1x32xf32>
    %327 = vector.shape_cast %326 : vector<1x1x32xf32> to vector<1x32xf32>
    %cst_98 = arith.constant dense<0.000000e+00> : vector<16xf32>
    %328 = vector.multi_reduction <add>, %323, %cst_98 [1] : vector<16x32xf32> to vector<16xf32>
    %329 = vector.shape_cast %328 : vector<16xf32> to vector<16x1xf32>
    %cst_99 = arith.constant 3.200000e+01 : f32
    %330 = vector.broadcast %cst_99 : f32 to vector<16x1xf32>
    %331 = arith.divf %329, %330 : vector<16x1xf32>
    %332 = vector.broadcast %331 : vector<16x1xf32> to vector<16x32xf32>
    %333 = arith.subf %323, %332 : vector<16x32xf32>
    %334 = arith.mulf %333, %333 : vector<16x32xf32>
    %cst_100 = arith.constant dense<0.000000e+00> : vector<16xf32>
    %335 = vector.multi_reduction <add>, %334, %cst_100 [1] : vector<16x32xf32> to vector<16xf32>
    %336 = vector.shape_cast %335 : vector<16xf32> to vector<16x1xf32>
    %cst_101 = arith.constant 3.200000e+01 : f32
    %337 = vector.broadcast %cst_101 : f32 to vector<16x1xf32>
    %338 = arith.divf %336, %337 : vector<16x1xf32>
    %339 = vector.broadcast %331 : vector<16x1xf32> to vector<16x32xf32>
    %340 = arith.subf %323, %339 : vector<16x32xf32>
    %cst_102 = arith.constant 9.99999996E-13 : f32
    %341 = vector.broadcast %cst_102 : f32 to vector<16x1xf32>
    %342 = arith.addf %338, %341 : vector<16x1xf32>
    %343 = math.rsqrt %342 : vector<16x1xf32>
    %344 = vector.broadcast %343 : vector<16x1xf32> to vector<16x32xf32>
    %345 = arith.mulf %340, %344 : vector<16x32xf32>
    %346 = vector.broadcast %325 : vector<1x32xf32> to vector<16x32xf32>
    %347 = arith.mulf %345, %346 : vector<16x32xf32>
    %348 = vector.broadcast %327 : vector<1x32xf32> to vector<16x32xf32>
    %349 = arith.addf %347, %348 : vector<16x32xf32>
    %c1_103 = arith.constant 1 : index
    %c0_104 = arith.constant 0 : index
    %c0_105 = arith.constant 0 : index
    %350 = vector.load %arg13[%c1_103, %c0_104, %c0_105] : memref<2x32x64xf32, #tpu.memory_space<vmem>>, vector<1x32x64xf32>
    %351 = vector.shape_cast %350 : vector<1x32x64xf32> to vector<32x64xf32>
    %cst_106 = arith.constant dense<0.000000e+00> : vector<16x64xf32>
    %352 = tpu.matmul %349, %351, %cst_106 {dimension_numbers = #tpu.dot_dimension_numbers<[1], [0], [0], [1], [0, 0, 1, 1], [], []>} : vector<16x32xf32>, vector<32x64xf32>, vector<16x64xf32> -> vector<16x64xf32>
    %c1_107 = arith.constant 1 : index
    %c0_108 = arith.constant 0 : index
    %c0_109 = arith.constant 0 : index
    %353 = vector.load %arg14[%c1_107, %c0_108, %c0_109] : memref<2x1x64xf32, #tpu.memory_space<vmem>>, vector<1x1x64xf32>
    %354 = vector.shape_cast %353 : vector<1x1x64xf32> to vector<1x64xf32>
    %355 = vector.broadcast %354 : vector<1x64xf32> to vector<16x64xf32>
    %356 = arith.addf %352, %355 : vector<16x64xf32>
    %cst_110 = arith.constant 0.636619746 : f32
    %357 = math.sqrt %cst_110 : f32
    %cst_111 = arith.constant 5.000000e-01 : f32
    %358 = vector.broadcast %cst_111 : f32 to vector<16x64xf32>
    %359 = arith.mulf %358, %356 : vector<16x64xf32>
    %cst_112 = arith.constant 4.471500e-02 : f32
    %360 = vector.broadcast %cst_112 : f32 to vector<16x64xf32>
    %361 = arith.mulf %360, %356 : vector<16x64xf32>
    %362 = arith.mulf %361, %356 : vector<16x64xf32>
    %363 = arith.mulf %362, %356 : vector<16x64xf32>
    %364 = arith.addf %356, %363 : vector<16x64xf32>
    %365 = vector.broadcast %357 : f32 to vector<16x64xf32>
    %366 = arith.mulf %365, %364 : vector<16x64xf32>
    %367 = math.tanh %366 : vector<16x64xf32>
    %cst_113 = arith.constant 1.000000e+00 : f32
    %368 = vector.broadcast %cst_113 : f32 to vector<16x64xf32>
    %369 = arith.addf %368, %367 : vector<16x64xf32>
    %370 = arith.mulf %359, %369 : vector<16x64xf32>
    %c1_114 = arith.constant 1 : index
    %c0_115 = arith.constant 0 : index
    %c0_116 = arith.constant 0 : index
    %371 = vector.load %arg15[%c1_114, %c0_115, %c0_116] : memref<2x64x32xf32, #tpu.memory_space<vmem>>, vector<1x64x32xf32>
    %372 = vector.shape_cast %371 : vector<1x64x32xf32> to vector<64x32xf32>
    %cst_117 = arith.constant dense<0.000000e+00> : vector<16x32xf32>
    %373 = tpu.matmul %370, %372, %cst_117 {dimension_numbers = #tpu.dot_dimension_numbers<[1], [0], [0], [1], [0, 0, 1, 1], [], []>} : vector<16x64xf32>, vector<64x32xf32>, vector<16x32xf32> -> vector<16x32xf32>
    %c1_118 = arith.constant 1 : index
    %c0_119 = arith.constant 0 : index
    %c0_120 = arith.constant 0 : index
    %374 = vector.load %arg16[%c1_118, %c0_119, %c0_120] : memref<2x1x32xf32, #tpu.memory_space<vmem>>, vector<1x1x32xf32>
    %375 = vector.shape_cast %374 : vector<1x1x32xf32> to vector<1x32xf32>
    %376 = vector.broadcast %375 : vector<1x32xf32> to vector<16x32xf32>
    %377 = arith.addf %373, %376 : vector<16x32xf32>
    %378 = arith.addf %377, %349 : vector<16x32xf32>
    %c1_121 = arith.constant 1 : index
    %c0_122 = arith.constant 0 : index
    %c0_123 = arith.constant 0 : index
    %379 = vector.load %arg17[%c1_121, %c0_122, %c0_123] : memref<2x1x32xf32, #tpu.memory_space<vmem>>, vector<1x1x32xf32>
    %380 = vector.shape_cast %379 : vector<1x1x32xf32> to vector<1x32xf32>
    %c1_124 = arith.constant 1 : index
    %c0_125 = arith.constant 0 : index
    %c0_126 = arith.constant 0 : index
    %381 = vector.load %arg18[%c1_124, %c0_125, %c0_126] : memref<2x1x32xf32, #tpu.memory_space<vmem>>, vector<1x1x32xf32>
    %382 = vector.shape_cast %381 : vector<1x1x32xf32> to vector<1x32xf32>
    %cst_127 = arith.constant dense<0.000000e+00> : vector<16xf32>
    %383 = vector.multi_reduction <add>, %378, %cst_127 [1] : vector<16x32xf32> to vector<16xf32>
    %384 = vector.shape_cast %383 : vector<16xf32> to vector<16x1xf32>
    %cst_128 = arith.constant 3.200000e+01 : f32
    %385 = vector.broadcast %cst_128 : f32 to vector<16x1xf32>
    %386 = arith.divf %384, %385 : vector<16x1xf32>
    %387 = vector.broadcast %386 : vector<16x1xf32> to vector<16x32xf32>
    %388 = arith.subf %378, %387 : vector<16x32xf32>
    %389 = arith.mulf %388, %388 : vector<16x32xf32>
    %cst_129 = arith.constant dense<0.000000e+00> : vector<16xf32>
    %390 = vector.multi_reduction <add>, %389, %cst_129 [1] : vector<16x32xf32> to vector<16xf32>
    %391 = vector.shape_cast %390 : vector<16xf32> to vector<16x1xf32>
    %cst_130 = arith.constant 3.200000e+01 : f32
    %392 = vector.broadcast %cst_130 : f32 to vector<16x1xf32>
    %393 = arith.divf %391, %392 : vector<16x1xf32>
    %394 = vector.broadcast %386 : vector<16x1xf32> to vector<16x32xf32>
    %395 = arith.subf %378, %394 : vector<16x32xf32>
    %cst_131 = arith.constant 9.99999996E-13 : f32
    %396 = vector.broadcast %cst_131 : f32 to vector<16x1xf32>
    %397 = arith.addf %393, %396 : vector<16x1xf32>
    %398 = math.rsqrt %397 : vector<16x1xf32>
    %399 = vector.broadcast %398 : vector<16x1xf32> to vector<16x32xf32>
    %400 = arith.mulf %395, %399 : vector<16x32xf32>
    %401 = vector.broadcast %380 : vector<1x32xf32> to vector<16x32xf32>
    %402 = arith.mulf %400, %401 : vector<16x32xf32>
    %403 = vector.broadcast %382 : vector<1x32xf32> to vector<16x32xf32>
    %404 = arith.addf %402, %403 : vector<16x32xf32>
    %405 = vector.extract_strided_slice %404 {offsets = [0, 0], sizes = [1, 32], strides = [1, 1]} : vector<16x32xf32> to vector<1x32xf32>
    %406 = vector.extract_strided_slice %404 {offsets = [1, 0], sizes = [1, 32], strides = [1, 1]} : vector<16x32xf32> to vector<1x32xf32>
    %407 = vector.extract_strided_slice %404 {offsets = [2, 0], sizes = [1, 32], strides = [1, 1]} : vector<16x32xf32> to vector<1x32xf32>
    %408 = vector.extract_strided_slice %404 {offsets = [3, 0], sizes = [1, 32], strides = [1, 1]} : vector<16x32xf32> to vector<1x32xf32>
    %409 = vector.extract_strided_slice %404 {offsets = [4, 0], sizes = [1, 32], strides = [1, 1]} : vector<16x32xf32> to vector<1x32xf32>
    %410 = vector.extract_strided_slice %404 {offsets = [5, 0], sizes = [1, 32], strides = [1, 1]} : vector<16x32xf32> to vector<1x32xf32>
    %411 = vector.extract_strided_slice %404 {offsets = [6, 0], sizes = [1, 32], strides = [1, 1]} : vector<16x32xf32> to vector<1x32xf32>
    %412 = vector.extract_strided_slice %404 {offsets = [7, 0], sizes = [1, 32], strides = [1, 1]} : vector<16x32xf32> to vector<1x32xf32>
    %413 = tpu.concatenate %405, %406, %407, %408, %409, %410, %411, %412 in 1 : vector<1x32xf32>, vector<1x32xf32>, vector<1x32xf32>, vector<1x32xf32>, vector<1x32xf32>, vector<1x32xf32>, vector<1x32xf32>, vector<1x32xf32> -> vector<1x256xf32>
    %414 = vector.extract_strided_slice %404 {offsets = [8, 0], sizes = [1, 32], strides = [1, 1]} : vector<16x32xf32> to vector<1x32xf32>
    %415 = vector.extract_strided_slice %404 {offsets = [9, 0], sizes = [1, 32], strides = [1, 1]} : vector<16x32xf32> to vector<1x32xf32>
    %416 = vector.extract_strided_slice %404 {offsets = [10, 0], sizes = [1, 32], strides = [1, 1]} : vector<16x32xf32> to vector<1x32xf32>
    %417 = vector.extract_strided_slice %404 {offsets = [11, 0], sizes = [1, 32], strides = [1, 1]} : vector<16x32xf32> to vector<1x32xf32>
    %418 = vector.extract_strided_slice %404 {offsets = [12, 0], sizes = [1, 32], strides = [1, 1]} : vector<16x32xf32> to vector<1x32xf32>
    %419 = vector.extract_strided_slice %404 {offsets = [13, 0], sizes = [1, 32], strides = [1, 1]} : vector<16x32xf32> to vector<1x32xf32>
    %420 = vector.extract_strided_slice %404 {offsets = [14, 0], sizes = [1, 32], strides = [1, 1]} : vector<16x32xf32> to vector<1x32xf32>
    %421 = vector.extract_strided_slice %404 {offsets = [15, 0], sizes = [1, 32], strides = [1, 1]} : vector<16x32xf32> to vector<1x32xf32>
    %422 = tpu.concatenate %414, %415, %416, %417, %418, %419, %420, %421 in 1 : vector<1x32xf32>, vector<1x32xf32>, vector<1x32xf32>, vector<1x32xf32>, vector<1x32xf32>, vector<1x32xf32>, vector<1x32xf32>, vector<1x32xf32> -> vector<1x256xf32>
    %423 = tpu.concatenate %413, %422 in 0 : vector<1x256xf32>, vector<1x256xf32> -> vector<2x256xf32>
    %c0_132 = arith.constant 0 : index
    %c0_133 = arith.constant 0 : index
    %424 = vector.load %arg21[%c0_132, %c0_133] : memref<2x256xf32, #tpu.memory_space<vmem>>, vector<2x256xf32>
    tpu.vector_store %arg21[%c0_132, %c0_133], %423 {strides = array<i32>} : memref<2x256xf32, #tpu.memory_space<vmem>>, vector<2x256xf32>,
    %425 = vector.extract_strided_slice %404 {offsets = [0, 0], sizes = [1, 32], strides = [1, 1]} : vector<16x32xf32> to vector<1x32xf32>
    %426 = vector.extract_strided_slice %404 {offsets = [8, 0], sizes = [1, 32], strides = [1, 1]} : vector<16x32xf32> to vector<1x32xf32>
    %427 = tpu.concatenate %425, %426 in 0 : vector<1x32xf32>, vector<1x32xf32> -> vector<2x32xf32>
    %c0_134 = arith.constant 0 : index
    %c0_135 = arith.constant 0 : index
    %428 = vector.load %arg19[%c0_134, %c0_135] : memref<32x32xf32, #tpu.memory_space<vmem>>, vector<32x32xf32>
    %cst_136 = arith.constant dense<0.000000e+00> : vector<2x32xf32>
    %429 = tpu.matmul %427, %428, %cst_136 {dimension_numbers = #tpu.dot_dimension_numbers<[1], [0], [0], [1], [0, 0, 1, 1], [], []>} : vector<2x32xf32>, vector<32x32xf32>, vector<2x32xf32> -> vector<2x32xf32>
    %c0_137 = arith.constant 0 : index
    %c0_138 = arith.constant 0 : index
    %430 = vector.load %arg20[%c0_137, %c0_138] : memref<1x32xf32, #tpu.memory_space<vmem>>, vector<1x32xf32>
    %431 = vector.broadcast %430 : vector<1x32xf32> to vector<2x32xf32>
    %432 = arith.addf %429, %431 : vector<2x32xf32>
    %433 = math.tanh %432 : vector<2x32xf32>
    %cst_139 = arith.constant 0.000000e+00 : f32
    %434 = vector.broadcast %cst_139 : f32 to vector<2x96xf32>
    %435 = tpu.concatenate %433, %434 in 1 : vector<2x32xf32>, vector<2x96xf32> -> vector<2x128xf32>
    %c0_140 = arith.constant 0 : index
    %c0_141 = arith.constant 0 : index
    %436 = vector.load %arg22[%c0_140, %c0_141] : memref<2x128xf32, #tpu.memory_space<vmem>>, vector<2x128xf32>
    tpu.vector_store %arg22[%c0_140, %c0_141], %435 {strides = array<i32>} : memref<2x128xf32, #tpu.memory_space<vmem>>, vector<2x128xf32>,
    return
  }
  func.func @transform_0(%arg0: i32) -> (i32, i32) {
    %c0_i32 = arith.constant 0 : i32
    %c0_i32_0 = arith.constant 0 : i32
    %c0_i32_1 = arith.constant 0 : i32
    return %c0_i32, %c0_i32_0 : i32, i32
  }
  func.func @transform_1(%arg0: i32) -> (i32, i32) {
    %c0_i32 = arith.constant 0 : i32
    %c0_i32_0 = arith.constant 0 : i32
    %c0_i32_1 = arith.constant 0 : i32
    return %c0_i32, %c0_i32_0 : i32, i32
  }
  func.func @transform_2(%arg0: i32) -> (i32, i32) {
    %c0_i32 = arith.constant 0 : i32
    %c0_i32_0 = arith.constant 0 : i32
    %c0_i32_1 = arith.constant 0 : i32
    return %c0_i32, %c0_i32_0 : i32, i32
  }
  func.func @transform_3(%arg0: i32) -> (i32, i32) {
    %c0_i32 = arith.constant 0 : i32
    %c0_i32_0 = arith.constant 0 : i32
    %c0_i32_1 = arith.constant 0 : i32
    return %c0_i32, %c0_i32_0 : i32, i32
  }
  func.func @transform_4(%arg0: i32) -> (i32, i32) {
    %c0_i32 = arith.constant 0 : i32
    %c0_i32_0 = arith.constant 0 : i32
    %c0_i32_1 = arith.constant 0 : i32
    return %c0_i32, %c0_i32_0 : i32, i32
  }
  func.func @transform_5(%arg0: i32) -> (i32, i32) {
    %c0_i32 = arith.constant 0 : i32
    %c0_i32_0 = arith.constant 0 : i32
    %c0_i32_1 = arith.constant 0 : i32
    return %c0_i32, %c0_i32_0 : i32, i32
  }
  func.func @transform_6(%arg0: i32) -> (i32, i32, i32) {
    %c0_i32 = arith.constant 0 : i32
    %c0_i32_0 = arith.constant 0 : i32
    %c0_i32_1 = arith.constant 0 : i32
    %c0_i32_2 = arith.constant 0 : i32
    return %c0_i32, %c0_i32_0, %c0_i32_1 : i32, i32, i32
  }
  func.func @transform_7(%arg0: i32) -> (i32, i32, i32) {
    %c0_i32 = arith.constant 0 : i32
    %c0_i32_0 = arith.constant 0 : i32
    %c0_i32_1 = arith.constant 0 : i32
    %c0_i32_2 = arith.constant 0 : i32
    return %c0_i32, %c0_i32_0, %c0_i32_1 : i32, i32, i32
  }
  func.func @transform_8(%arg0: i32) -> (i32, i32, i32) {
    %c0_i32 = arith.constant 0 : i32
    %c0_i32_0 = arith.constant 0 : i32
    %c0_i32_1 = arith.constant 0 : i32
    %c0_i32_2 = arith.constant 0 : i32
    return %c0_i32, %c0_i32_0, %c0_i32_1 : i32, i32, i32
  }
  func.func @transform_9(%arg0: i32) -> (i32, i32, i32) {
    %c0_i32 = arith.constant 0 : i32
    %c0_i32_0 = arith.constant 0 : i32
    %c0_i32_1 = arith.constant 0 : i32
    %c0_i32_2 = arith.constant 0 : i32
    return %c0_i32, %c0_i32_0, %c0_i32_1 : i32, i32, i32
  }
  func.func @transform_10(%arg0: i32) -> (i32, i32, i32) {
    %c0_i32 = arith.constant 0 : i32
    %c0_i32_0 = arith.constant 0 : i32
    %c0_i32_1 = arith.constant 0 : i32
    %c0_i32_2 = arith.constant 0 : i32
    return %c0_i32, %c0_i32_0, %c0_i32_1 : i32, i32, i32
  }
  func.func @transform_11(%arg0: i32) -> (i32, i32, i32) {
    %c0_i32 = arith.constant 0 : i32
    %c0_i32_0 = arith.constant 0 : i32
    %c0_i32_1 = arith.constant 0 : i32
    %c0_i32_2 = arith.constant 0 : i32
    return %c0_i32, %c0_i32_0, %c0_i32_1 : i32, i32, i32
  }
  func.func @transform_12(%arg0: i32) -> (i32, i32, i32) {
    %c0_i32 = arith.constant 0 : i32
    %c0_i32_0 = arith.constant 0 : i32
    %c0_i32_1 = arith.constant 0 : i32
    %c0_i32_2 = arith.constant 0 : i32
    return %c0_i32, %c0_i32_0, %c0_i32_1 : i32, i32, i32
  }
  func.func @transform_13(%arg0: i32) -> (i32, i32, i32) {
    %c0_i32 = arith.constant 0 : i32
    %c0_i32_0 = arith.constant 0 : i32
    %c0_i32_1 = arith.constant 0 : i32
    %c0_i32_2 = arith.constant 0 : i32
    return %c0_i32, %c0_i32_0, %c0_i32_1 : i32, i32, i32
  }
  func.func @transform_14(%arg0: i32) -> (i32, i32, i32) {
    %c0_i32 = arith.constant 0 : i32
    %c0_i32_0 = arith.constant 0 : i32
    %c0_i32_1 = arith.constant 0 : i32
    %c0_i32_2 = arith.constant 0 : i32
    return %c0_i32, %c0_i32_0, %c0_i32_1 : i32, i32, i32
  }
  func.func @transform_15(%arg0: i32) -> (i32, i32, i32) {
    %c0_i32 = arith.constant 0 : i32
    %c0_i32_0 = arith.constant 0 : i32
    %c0_i32_1 = arith.constant 0 : i32
    %c0_i32_2 = arith.constant 0 : i32
    return %c0_i32, %c0_i32_0, %c0_i32_1 : i32, i32, i32
  }
  func.func @transform_16(%arg0: i32) -> (i32, i32, i32) {
    %c0_i32 = arith.constant 0 : i32
    %c0_i32_0 = arith.constant 0 : i32
    %c0_i32_1 = arith.constant 0 : i32
    %c0_i32_2 = arith.constant 0 : i32
    return %c0_i32, %c0_i32_0, %c0_i32_1 : i32, i32, i32
  }
  func.func @transform_17(%arg0: i32) -> (i32, i32, i32) {
    %c0_i32 = arith.constant 0 : i32
    %c0_i32_0 = arith.constant 0 : i32
    %c0_i32_1 = arith.constant 0 : i32
    %c0_i32_2 = arith.constant 0 : i32
    return %c0_i32, %c0_i32_0, %c0_i32_1 : i32, i32, i32
  }
  func.func @transform_18(%arg0: i32) -> (i32, i32) {
    %c0_i32 = arith.constant 0 : i32
    %c0_i32_0 = arith.constant 0 : i32
    %c0_i32_1 = arith.constant 0 : i32
    return %c0_i32, %c0_i32_0 : i32, i32
  }
  func.func @transform_19(%arg0: i32) -> (i32, i32) {
    %c0_i32 = arith.constant 0 : i32
    %c0_i32_0 = arith.constant 0 : i32
    %c0_i32_1 = arith.constant 0 : i32
    return %c0_i32, %c0_i32_0 : i32, i32
  }
  func.func @transform_20(%arg0: i32) -> (i32, i32) {
    %c0_i32 = arith.constant 0 : i32
    %c0_i32_0 = arith.constant 0 : i32
    %c0_i32_1 = arith.constant 0 : i32
    return %c0_i32, %c0_i32_0 : i32, i32
  }
  func.func @transform_21(%arg0: i32) -> (i32, i32) {
    %c0_i32 = arith.constant 0 : i32
    %c0_i32_0 = arith.constant 0 : i32
    %c0_i32_1 = arith.constant 0 : i32
    return %c0_i32, %c0_i32_0 : i32, i32
  }
}

</mosaic_0001>

<bundles_post_ra>
// kernel: _lambda_.1
= control target key start
LH: loop header
LB: loop body
LE: loop exit
PB: predicated region body
PF: predicated region fallthrough
CT: control target
= control target key end

     0   :  { %s5593_s0 = inlined_call_operand.vmem [shape: f32[16,32], index: 0, kind: input, shape index: {}]   ;;  %s5594_s1 = inlined_call_operand.vmem [shape: f32[16,32], index: 1, kind: input, shape index: {}]   ;;  %s5595_s2 = inlined_call_operand.vmem [shape: f32[2,32], index: 2, kind: input, shape index: {}]   ;;  %s5596_s3 = inlined_call_operand.vmem [shape: f32[2,8], index: 3, kind: input, shape index: {}]   ;;  %s5597_s4 = inlined_call_operand.vmem [shape: f32[1,32], index: 4, kind: input, shape index: {}]   ;;  %s5598_s5 = inlined_call_operand.vmem [shape: f32[1,32], index: 5, kind: input, shape index: {}]   ;;  %s5599_s6 = inlined_call_operand.vmem [shape: f32[2,32,96], index: 6, kind: input, shape index: {}]   ;;  %s5600_s7 = inlined_call_operand.vmem [shape: f32[2,1,96], index: 7, kind: input, shape index: {}]   ;;  %s5601_s8 = inlined_call_operand.vmem [shape: f32[2,32,32], index: 8, kind: input, shape index: {}]   ;;  %s5602_s9 = inlined_call_operand.vmem [shape: f32[2,1,32], index: 9, kind: input, shape index: {}]   ;;  %s5603_s10 = inlined_call_operand.vmem [shape: f32[2,1,32], index: 10, kind: input, shape index: {}]   ;;  %s5604_s11 = inlined_call_operand.vmem [shape: f32[2,1,32], index: 11, kind: input, shape index: {}]   ;;  %s5605_s12 = inlined_call_operand.vmem [shape: f32[2,32,64], index: 12, kind: input, shape index: {}]   ;;  %s5606_s13 = inlined_call_operand.vmem [shape: f32[2,1,64], index: 13, kind: input, shape index: {}]   ;;  %s5607_s14 = inlined_call_operand.vmem [shape: f32[2,64,32], index: 14, kind: input, shape index: {}]   ;;  %s5608_s15 = inlined_call_operand.vmem [shape: f32[2,1,32], index: 15, kind: input, shape index: {}]   ;;  %s5609_s16 = inlined_call_operand.vmem [shape: f32[2,1,32], index: 16, kind: input, shape index: {}]   ;;  %s5610_s17 = inlined_call_operand.vmem [shape: f32[2,1,32], index: 17, kind: input, shape index: {}]   ;;  %s5611_s18 = inlined_call_operand.vmem [shape: f32[32,32], index: 18, kind: input, shape index: {}]   ;;  %s5612_s19 = inlined_call_operand.vmem [shape: f32[1,32], index: 19, kind: input, shape index: {}]   ;;  %s5613_s20 = inlined_call_operand.hbm [shape: f32[2,256], index: 20, kind: output, shape index: {0}]   ;;  %s5614_s21 = inlined_call_operand.hbm [shape: f32[2,128], index: 21, kind: output, shape index: {1}]  }
   0x1   :  { %5622 = sst [smem:[#allocation8_spill]] %s5593_s0 }
   0x2   :  { %5623 = sst [smem:[#allocation9_spill]] %s5594_s1 }
   0x3   :  { %5624 = sst [smem:[#allocation10_spill]] %s5595_s2 }
   0x4   :  { %5625 = sst [smem:[#allocation11_spill]] %s5596_s3 }
   0x5   :  { %5626 = sst [smem:[#allocation12_spill]] %s5597_s4 }
   0x6   :  { %5627 = sst [smem:[#allocation13_spill]] %s5598_s5 }
   0x7   :  { %27 = vsyncpa [#allocation3], 0  ;;  %s5628_s26 = sld [smem:[#allocation9_spill]]  ;;  %s5629_s28 = sld [smem:[#allocation8_spill]] }
   0x8   :  { %s5630_s4 = sld [smem:[#allocation10_spill]] }
   0xd   :  { %v69_v0 = vld [vmem:[%s5628_s26] sm:$0xff]  ;;  %v71_v4 = vld [vmem:[%s5629_s28 + $0x8] sm:$0xff] }
   0xe   :  { %v70_v1 = vld [vmem:[%s5629_s28] sm:$0xff] }
   0xf   :  { %v4022_v2 = vld [vmem:[%s5630_s4] ss:$0 sm:$0xff]  ;;  %v72_v3 = vadd.f32 %v70_v1, %v69_v0 }
  0x10   :  { %28 = vsyncpa [#allocation5], 0  ;;  %vm83_vm0 = vcmask 261120   ;;  %v73_v5 = vadd.f32 %v71_v4, %v69_v0  ;;  %v133_v20 = vld [vmem:[%s5599_s6] sm:$0xff]  ;;  %v134_v21 = vld [vmem:[%s5599_s6 + $0x8] sm:$0xff]  ;;  %s5631_s29 = sld [smem:[#allocation12_spill]]  ;;  %v239_v62 = vlaneseq }
  0x11   :  { %v79_v6 = vadd.f32 %v4022_v2, %v72_v3  ;;  %v135_v22 = vld [vmem:[%s5599_s6 + $0x10] sm:$0xff]  ;;  %v4536_v23 = vpack.c.bf16 %v134_v21, %v133_v20  ;;  %v136_v24 = vld [vmem:[%s5599_s6 + $0x18] sm:$0xff]  ;;  %s5632_s30 = sld [smem:[#allocation13_spill]]  ;;  %v4778_v42 = vmov 0.0   ;;  %v4025_v43 = vld [vmem:[%s5600_s7] ss:$0 sm:$0xff] }
  0x12   :  { %v80_v7 = vadd.f32 %v4022_v2, %v73_v5  ;;  %v4540_v25 = vpack.c.bf16 %v136_v24, %v135_v22  ;;  %4272 = vmatprep.subr.mxu1 %v4778_v42  ;;  %vm4779_vm1 = vmmov 0   ;;  %s4780_s23 = smov 112   ;;  %s4781_s1 = smov 120   ;;  %vm249_vm2 = vcmask 64512  }
  0x13   :  { %v84_v8 = vsel %vm83_vm0, %v79_v6, 0.0  ;;  %4537 = vmatprep.subr.bf16.mxu0 %v4536_v23  ;;  %4274 = vmatprep.mubr.msk.f32.mxu1 %vm4779_vm1, %v4778_v42  ;;  %s4782_s24 = smov 104   ;;  %s4783_s2 = smov 96   ;;  %v240_v1 = vshrl.u32 %v239_v62, 7  ;;  %vm1565_vm3 = vcmask 130048   ;;  %vm1567_vm4 = vcmask 195584  }
  0x14   :  { %85 = vadd.xlane.f32.xlu0 %v84_v8  ;;  %v87_v9 = vsel %vm83_vm0, %v80_v7, 0.0  ;;  %4539 = vmatpush3.bf16.msra.mxu0 %v4536_v23  ;;  %s5633_s27 = sld [smem:[#allocation11_spill]]  ;;  %s4784_s3 = smov 64   ;;  %vm1847_vm5 = vcmask 523264   ;;  %vm3890_vm6 = vcmask 1040384   ;;  %vm3846_vm7 = vcmask 785408  }
  0x15   :  { %4541 = vmatprep.subr.bf16.mxu0 %v4540_v25  ;;  %v241_v3 = vsub.s32 0, %v240_v1  ;;  %s5620_s28 = smov 8   ;;  %s5616_s0 = smov 24  }
  0x16   :  { %v4023_v33 = vld [vmem:[%s5631_s29] ss:$0 sm:$0xff]  ;;  %s5618_s29 = smov 16   ;;  %s5635_s25 = smov 16  }
  0x17   :  { %v4024_v35 = vld [vmem:[%s5632_s30] ss:$0 sm:$0xff] }
  0x18   :  { %88 = vadd.xlane.f32.xlu0 %v87_v9  ;;  %4543 = vmatpush3.bf16.msra.mxu0 %v4540_v25 }
  0x19   :  { %4292 = vmatprep.subr.mxu0 %v4778_v42 }
  0x1a   :  { %v127_v63 = vld [vmem:[%s5633_s27] sm:$0x3] }
  0x1b   :  { %v128_v0 = vsub.f32 1.0, %v127_v63 }
  0x1d   :  { %v129_v2 = vmul.f32 -1e+09, %v128_v0 }
  0x1f   :  { %v5048_v4 = vrot.slane %v129_v2, %v241_v3 }
  0xa1   :  { %v86_v10 = vpop.xlane.xlu0 %85 }
  0xa2   :  { %v91_v11 = vmul.f32 0.03125, %v86_v10 }
  0xa4   :  { %v93_v12 = vsub.f32 %v79_v6, %v91_v11 }
  0xa5   :  { %v89_v13 = vpop.xlane.xlu0 %88 }
  0xa6   :  { %v92_v14 = vmul.f32 0.03125, %v89_v13  ;;  %v95_v15 = vmul.f32 %v93_v12, %v93_v12  ;;  %v131_v13 = vrot.slane %v129_v2, 1 }
  0xa8   :  { %v94_v16 = vsub.f32 %v80_v7, %v92_v14  ;;  %v97_v17 = vsel %vm83_vm0, %v95_v15, 0.0 }
  0xa9   :  { %98 = vadd.xlane.f32.xlu1 %v97_v17 }
  0xaa   :  { %v96_v18 = vmul.f32 %v94_v16, %v94_v16 }
  0xac   :  { %v100_v19 = vsel %vm83_vm0, %v96_v18, 0.0 }
  0xad   :  { %101 = vadd.xlane.f32.xlu1 %v100_v19  ;;  %v5055_v19 = vrot.slane %v131_v13, %v241_v3 }
 0x136   :  { %v99_v26 = vpop.xlane.xlu1 %98 }
 0x137   :  { %v103_v27 = vmul.f32 0.03125, %v99_v26 }
 0x139   :  { %v105_v28 = vadd.f32 1e-12, %v103_v27 }
 0x13a   :  { %v102_v29 = vpop.xlane.xlu1 %101 }
 0x13b   :  { %4636 = vrsqrt.f32 %v105_v28  ;;  %v104_v30 = vmul.f32 0.03125, %v102_v29 }
 0x13d   :  { %v106_v31 = vadd.f32 1e-12, %v104_v30 }
 0x13f   :  { %4638 = vrsqrt.f32 %v106_v31 }
 0x145   :  { %v4637_v32 = vpop.eup %4636 }
 0x146   :  { %v109_v34 = vmul.f32 %v4637_v32, %v93_v12 }
 0x148   :  { %v117_v36 = vmul.f32 %v4023_v33, %v109_v34 }
 0x149   :  { %v4639_v37 = vpop.eup %4638 }
 0x14a   :  { %v110_v38 = vmul.f32 %v4639_v37, %v94_v16  ;;  %v4936_v39 = vadd.f32 %v4024_v35, %v117_v36 }
 0x14c   :  { %v118_v40 = vmul.f32 %v4023_v33, %v110_v38  ;;  %4269 = vmatprep.mubr.msk.f32.mxu0 %vm83_vm0, %v4936_v39 }
 0x14e   :  { %v4940_v41 = vadd.f32 %v4024_v35, %v118_v40 }
 0x150   :  { %4270 = vmatmul.mubr.msk.f32.vlgmr.msra.gmra.mrb[0].mxu0 %vm83_vm0, %v4940_v41 }
 0x151   :  { %4294 = vmatprep.mubr.msk.f32.mxu0 %vm4779_vm1, %v4778_v42 }
 0x223   :  { %v4271_v44 = vpop.f32.mrb[0].mxu0 }
 0x224   :  { %v216_v45 = vpop.f32.mrb[1].mxu0  ;;  %v4959_v47 = vadd.f32 %v4271_v44, %v4025_v43 }
 0x225   :  { %v4953_v46 = vadd.f32 %v4025_v43, %v216_v45 }
 0x227   :  { %228 = vrot.lane.b32.xlu1 %v4953_v46, %s4780_s23  ;;  %226 = vrot.lane.b32.xlu0 %v4953_v46, %s4781_s1 }
 0x22b   :  { %230 = vrot.lane.b32.xlu1 %v4953_v46, %s4782_s24  ;;  %235 = vrot.lane.b32.xlu0 %v4959_v47, %s4780_s23 }
 0x22f   :  { %233 = vrot.lane.b32.xlu1 %v4959_v47, %s4781_s1  ;;  %247 = vrot.lane.b32.xlu0 %v4953_v46, %s4783_s2 }
 0x233   :  { %237 = vrot.lane.b32.xlu1 %v4959_v47, %s4782_s24 }
 0x299   :  { %v4971_v48 = vpop.permute.xlu1 %228  ;;  %v4973_v49 = vpop.permute.xlu0 %226 }
 0x29a   :  { %400 = vrot.lane.b32.xlu0 %v4971_v48, %s4783_s2  ;;  %324 = vrot.lane.b32.xlu1 %v4973_v49, %s4783_s2 }
 0x29d   :  { %v4979_v50 = vpop.permute.xlu1 %230  ;;  %v4981_v51 = vpop.permute.xlu0 %235 }
 0x29e   :  { %552 = vrot.lane.b32.xlu0 %v4959_v47, %s4783_s2  ;;  %476 = vrot.lane.b32.xlu1 %v4979_v50, %s4783_s2 }
 0x2a1   :  { %v4987_v52 = vpop.permute.xlu1 %233  ;;  %v248_v53 = vpop.permute.xlu0 %247 }
 0x2a2   :  { %628 = vrot.lane.b32.xlu1 %v4987_v52, %s4783_s2  ;;  %704 = vrot.lane.b32.xlu0 %v4981_v51, %s4783_s2 }
 0x2a3   :  { %4273 = vmatpush3.xpose.msk.msra.mxu1 %vm249_vm2, %v248_v53 }
 0x2a4   :  { %4277 = vmatprep.subr.mxu1 %v4778_v42 }
 0x2a5   :  { %v4995_v54 = vpop.permute.xlu1 %237 }
 0x2a6   :  { %4275 = vmatmul.mubr.msk.f32.vlgmr.msra.gmra.mrb[0].mxu1 %vm249_vm2, %v4953_v46  ;;  %780 = vrot.lane.b32.xlu1 %v4995_v54, %s4783_s2 }
 0x2a7   :  { %4279 = vmatprep.mubr.msk.f32.mxu1 %vm4779_vm1, %v4778_v42 }
 0x30c   :  { %v325_v55 = vpop.permute.xlu1 %324  ;;  %v401_v56 = vpop.permute.xlu0 %400 }
 0x30d   :  { %4278 = vmatpush3.xpose.msk.msra.mxu1 %vm249_vm2, %v325_v55 }
 0x30e   :  { %4282 = vmatprep.subr.mxu1 %v4778_v42 }
 0x310   :  { %v477_v57 = vpop.permute.xlu1 %476  ;;  %4280 = vmatmul.mubr.msk.f32.vlgmr.msra.gmra.mrb[2].mxu1 %vm249_vm2, %v4973_v49  ;;  %v553_v58 = vpop.permute.xlu0 %552 }
 0x311   :  { %4283 = vmatpush3.xpose.msk.msra.mxu1 %vm249_vm2, %v401_v56  ;;  %4293 = vmatpush3.xpose.msk.msra.mxu0 %vm249_vm2, %v553_v58 }
 0x312   :  { %4284 = vmatprep.mubr.msk.f32.mxu1 %vm4779_vm1, %v4778_v42  ;;  %4287 = vmatprep.subr.mxu1 %v4778_v42 }
 0x313   :  { %4302 = vmatprep.subr.mxu0 %v4778_v42 }
 0x314   :  { %4285 = vmatmul.mubr.msk.f32.vlgmr.msra.gmra.mrb[4].mxu1 %vm249_vm2, %v4971_v48  ;;  %4295 = vmatmul.mubr.msk.f32.vlgmr.msra.gmra.mrb[2].mxu0 %vm249_vm2, %v4959_v47  ;;  %v705_v59 = vpop.permute.xlu0 %704  ;;  %v629_v60 = vpop.permute.xlu1 %628 }
 0x315   :  { %4288 = vmatpush3.xpose.msk.msra.mxu1 %vm249_vm2, %v477_v57  ;;  %4303 = vmatpush3.xpose.msk.msra.mxu0 %vm249_vm2, %v705_v59 }
 0x316   :  { %4289 = vmatprep.mubr.msk.f32.mxu1 %vm4779_vm1, %v4778_v42  ;;  %4304 = vmatprep.mubr.msk.f32.mxu0 %vm4779_vm1, %v4778_v42 }
 0x317   :  { %4297 = vmatprep.subr.mxu1 %v4778_v42  ;;  %4312 = vmatprep.subr.mxu0 %v4778_v42 }
 0x318   :  { %4290 = vmatmul.mubr.msk.f32.vlgmr.msra.gmra.mrb[6].mxu1 %vm249_vm2, %v4979_v50  ;;  %4305 = vmatmul.mubr.msk.f32.vlgmr.msra.gmra.mrb[4].mxu0 %vm249_vm2, %v4981_v51  ;;  %v781_v61 = vpop.permute.xlu1 %780 }
 0x319   :  { %4298 = vmatpush3.xpose.msk.msra.mxu1 %vm249_vm2, %v629_v60  ;;  %4299 = vmatprep.mubr.msk.f32.mxu1 %vm4779_vm1, %v4778_v42 }
 0x31a   :  { %4307 = vmatprep.subr.mxu1 %v4778_v42  ;;  %4314 = vmatprep.mubr.msk.f32.mxu0 %vm4779_vm1, %v4778_v42 }
 0x31c   :  { %4300 = vmatmul.mubr.msk.f32.vlgmr.msra.gmra.mrb[8].mxu1 %vm249_vm2, %v4987_v52 }
 0x31d   :  { %4308 = vmatpush3.xpose.msk.msra.mxu1 %vm249_vm2, %v781_v61  ;;  %4309 = vmatprep.mubr.msk.f32.mxu1 %vm4779_vm1, %v4778_v42 }
 0x31e   :  { %4317 = vmatprep.subr.mxu1 %v4778_v42 }
 0x320   :  { %4310 = vmatmul.mubr.msk.f32.vlgmr.msra.gmra.mrb[10].mxu1 %vm249_vm2, %v4995_v54 }
 0x321   :  { %4319 = vmatprep.mubr.msk.f32.mxu1 %vm4779_vm1, %v4778_v42 }
 0x379   :  { %v320_v5 = vpop.f32.mrb[0].mxu1 }
 0x37a   :  { %v321_v6 = vadd.f32 %v320_v5, %v5048_v4  ;;  %v4276_v7 = vpop.f32.mrb[1].mxu1 }
 0x37c   :  { %v856_v8 = vsel %vm249_vm2, %v321_v6, -inf }
 0x37d   :  { %857 = vmax.xlane.f32.xlu0 %v856_v8 }
 0x3e3   :  { %v396_v9 = vpop.f32.mrb[2].mxu1 }
 0x3e4   :  { %v397_v10 = vadd.f32 %v396_v9, %v5048_v4  ;;  %v4281_v11 = vpop.f32.mrb[3].mxu1 }
 0x3e6   :  { %v859_v12 = vsel %vm249_vm2, %v397_v10, -inf }
 0x3e7   :  { %860 = vmax.xlane.f32.xlu1 %v859_v12  ;;  %v472_v14 = vpop.f32.mrb[4].mxu1  ;;  %v624_v15 = vpop.f32.mrb[2].mxu0 }
 0x3e8   :  { %v473_v16 = vadd.f32 %v472_v14, %v5048_v4  ;;  %v4286_v17 = vpop.f32.mrb[5].mxu1  ;;  %v4296_v18 = vpop.f32.mrb[3].mxu0  ;;  %v625_v26 = vadd.f32 %v624_v15, %v5055_v19 }
 0x3ea   :  { %v862_v20 = vsel %vm249_vm2, %v473_v16, -inf  ;;  %v868_v31 = vsel %vm249_vm2, %v625_v26, -inf }
 0x3eb   :  { %863 = vmax.xlane.f32.xlu0 %v862_v20  ;;  %v548_v21 = vpop.f32.mrb[6].mxu1  ;;  %v776_v22 = vpop.f32.mrb[4].mxu0 }
 0x3ec   :  { %v5059_v23 = vadd.f32 %v548_v21, %v5048_v4  ;;  %v4291_v24 = vpop.f32.mrb[7].mxu1  ;;  %v4306_v25 = vpop.f32.mrb[5].mxu0  ;;  %v777_v30 = vadd.f32 %v776_v22, %v5055_v19 }
 0x3ee   :  { %v865_v27 = vsel %vm249_vm2, %v5059_v23, -inf  ;;  %v874_v34 = vsel %vm249_vm2, %v777_v30, -inf }
 0x3ef   :  { %866 = vmax.xlane.f32.xlu0 %v865_v27  ;;  %v700_v28 = vpop.f32.mrb[8].mxu1 }
 0x3f0   :  { %v4301_v29 = vpop.f32.mrb[9].mxu1  ;;  %v701_v35 = vadd.f32 %v700_v28, %v5055_v19 }
 0x3f2   :  { %v871_v37 = vsel %vm249_vm2, %v701_v35, -inf }
 0x3f3   :  { %v852_v32 = vpop.f32.mrb[10].mxu1  ;;  %869 = vmax.xlane.f32.xlu0 %v868_v31 }
 0x3f4   :  { %v4311_v33 = vpop.f32.mrb[11].mxu1  ;;  %v853_v36 = vadd.f32 %v852_v32, %v5055_v19 }
 0x3f6   :  { %v877_v38 = vsel %vm249_vm2, %v853_v36, -inf }
 0x3f7   :  { %875 = vmax.xlane.f32.xlu0 %v874_v34 }
 0x3f8   :  { %1020 = vrot.lane.b32.xlu1 %v4973_v49, %s4784_s3 }
 0x3fc   :  { %1096 = vrot.lane.b32.xlu1 %v4971_v48, %s4784_s3 }
 0x40a   :  { %v858_v40 = vpop.xlane.xlu0 %857 }
 0x40b   :  { %v880_v53 = vsub.f32 %v321_v6, %v858_v40 }
 0x40d   :  { %944 = vrot.lane.b32.xlu0 %v4953_v46, %s4784_s3  ;;  %v888_v58 = vmul.f32 1.442695, %v880_v53 }
 0x420   :  { %872 = vmax.xlane.f32.xlu1 %v871_v37 }
 0x424   :  { %878 = vmax.xlane.f32.xlu1 %v877_v38 }
 0x435   :  { %1172 = vrot.lane.b32.xlu1 %v4979_v50, %s4784_s3 }
 0x474   :  { %v861_v43 = vpop.xlane.xlu1 %860 }
 0x475   :  { %v881_v44 = vsub.f32 %v397_v10, %v861_v43 }
 0x477   :  { %v890_v45 = vmul.f32 1.442695, %v881_v44 }
 0x478   :  { %v1021_v48 = vpop.permute.xlu1 %1020  ;;  %v864_v49 = vpop.xlane.xlu0 %863 }
 0x479   :  { %4640 = vpow2.f32 %v890_v45  ;;  %4318 = vmatpush3.msra.mxu1 %v1021_v48  ;;  %v882_v62 = vsub.f32 %v473_v16, %v864_v49 }
 0x47a   :  { %4327 = vmatprep.subr.mxu1 %v4778_v42 }
 0x47b   :  { %v892_v1 = vmul.f32 1.442695, %v882_v62 }
 0x47c   :  { %v867_v46 = vpop.xlane.xlu0 %866  ;;  %v1097_v13 = vpop.permute.xlu1 %1096 }
 0x47d   :  { %v883_v11 = vsub.f32 %v5059_v23, %v867_v46 }
 0x47f   :  { %v894_v12 = vmul.f32 1.442695, %v883_v11 }
 0x480   :  { %v870_v55 = vpop.xlane.xlu0 %869 }
 0x481   :  { %v884_v56 = vsub.f32 %v625_v26, %v870_v55 }
 0x483   :  { %v4641_v57 = vpop.eup %4640  ;;  %v896_v59 = vmul.f32 1.442695, %v884_v56 }
 0x484   :  { %v876_v60 = vpop.xlane.xlu0 %875  ;;  %v907_v50 = vsel %vm249_vm2, %v4641_v57, 0.0 }
 0x485   :  { %4642 = vpow2.f32 %v896_v59  ;;  %v886_v61 = vsub.f32 %v777_v30, %v876_v60  ;;  %908 = vadd.xlane.f32.xlu1 %v907_v50 }
 0x486   :  { %4644 = vpow2.f32 %v888_v58 }
 0x487   :  { %v900_v63 = vmul.f32 1.442695, %v886_v61 }
 0x488   :  { %v945_v0 = vpop.permute.xlu0 %944 }
 0x489   :  { %4313 = vmatpush3.msra.mxu0 %v945_v0  ;;  %4646 = vpow2.f32 %v900_v63 }
 0x48a   :  { %4322 = vmatprep.subr.mxu0 %v4778_v42  ;;  %4648 = vpow2.f32 %v892_v1 }
 0x48b   :  { %4650 = vpow2.f32 %v894_v12 }
 0x48f   :  { %v5082_v2 = vpop.eup %4642 }
 0x490   :  { %v916_v3 = vsel %vm249_vm2, %v5082_v2, 0.0  ;;  %v4645_v5 = vpop.eup %4644 }
 0x491   :  { %917 = vadd.xlane.f32.xlu0 %v916_v3  ;;  %v904_v6 = vsel %vm249_vm2, %v4645_v5, 0.0 }
 0x493   :  { %v5087_v7 = vpop.eup %4646 }
 0x494   :  { %v922_v8 = vsel %vm249_vm2, %v5087_v7, 0.0  ;;  %v4649_v9 = vpop.eup %4648 }
 0x495   :  { %905 = vadd.xlane.f32.xlu0 %v904_v6  ;;  %v910_v10 = vsel %vm249_vm2, %v4649_v9, 0.0  ;;  %v4651_v20 = vpop.eup %4650  ;;  %v1584_v6 = vld [vmem:[%s5601_s8] sm:$0xff] }
 0x496   :  { %1324 = vrot.lane.b32.xlu1 %v4987_v52, %s4784_s3  ;;  %v913_v21 = vsel %vm249_vm2, %v4651_v20, 0.0 }
 0x499   :  { %923 = vadd.xlane.f32.xlu0 %v922_v8 }
 0x49d   :  { %911 = vadd.xlane.f32.xlu0 %v910_v10  ;;  %v1587_v10 = vld [vmem:[%s5601_s8 + $0x18] sm:$0xff] }
 0x4ad   :  { %v873_v14 = vpop.xlane.xlu1 %872 }
 0x4ae   :  { %v885_v15 = vsub.f32 %v701_v35, %v873_v14 }
 0x4b0   :  { %v898_v16 = vmul.f32 1.442695, %v885_v15 }
 0x4b1   :  { %v879_v17 = vpop.xlane.xlu1 %878 }
 0x4b2   :  { %4652 = vpow2.f32 %v898_v16  ;;  %v887_v18 = vsub.f32 %v853_v36, %v879_v17 }
 0x4b3   :  { %1248 = vrot.lane.b32.xlu0 %v4959_v47, %s4784_s3 }
 0x4b4   :  { %v902_v52 = vmul.f32 1.442695, %v887_v18 }
 0x4b5   :  { %v1173_v47 = vpop.permute.xlu1 %1172 }
 0x4b6   :  { %4654 = vpow2.f32 %v902_v52 }
 0x4b7   :  { %1400 = vrot.lane.b32.xlu0 %v4981_v51, %s4784_s3 }
 0x4ba   :  { %914 = vadd.xlane.f32.xlu1 %v913_v21 }
 0x4bc   :  { %v4653_v22 = vpop.eup %4652 }
 0x4bd   :  { %v919_v23 = vsel %vm249_vm2, %v4653_v22, 0.0 }
 0x4be   :  { %920 = vadd.xlane.f32.xlu1 %v919_v23 }
 0x4c0   :  { %v5101_v24 = vpop.eup %4654 }
 0x4c1   :  { %v925_v25 = vsel %vm249_vm2, %v5101_v24, 0.0 }
 0x4c2   :  { %926 = vadd.xlane.f32.xlu1 %v925_v25 }
 0x4d3   :  { %1476 = vrot.lane.b32.xlu1 %v4995_v54, %s4784_s3 }
 0x512   :  { %v909_v26 = vpop.xlane.xlu1 %908 }
 0x513   :  { %4656 = vrcp.f32 %v909_v26 }
 0x516   :  { %v1325_v44 = vpop.permute.xlu1 %1324 }
 0x51d   :  { %v4657_v51 = vpop.eup %4656 }
 0x51e   :  { %v937_v27 = vmul.f32 %v4657_v51, %v4641_v57  ;;  %v918_v28 = vpop.xlane.xlu0 %917 }
 0x520   :  { %4320 = vmatmul.mubr.msk.f32.vlgmr.msra.gmra.mrb[12].mxu1 %vm249_vm2, %v937_v27 }
 0x521   :  { %4328 = vmatpush3.msra.mxu1 %v1173_v47  ;;  %4329 = vmatprep.mubr.msk.f32.mxu1 %vm4779_vm1, %v4778_v42 }
 0x522   :  { %v906_v29 = vpop.xlane.xlu0 %905  ;;  %4337 = vmatprep.subr.mxu1 %v4778_v42 }
 0x523   :  { %4658 = vrcp.f32 %v906_v29 }
 0x526   :  { %v924_v30 = vpop.xlane.xlu0 %923 }
 0x52a   :  { %v912_v31 = vpop.xlane.xlu0 %911 }
 0x52b   :  { %4660 = vrcp.f32 %v912_v31 }
 0x52c   :  { %4662 = vrcp.f32 %v918_v28  ;;  %v4052_v28 = vld [vmem:[%s5602_s9] ss:$0 sm:$0xff] }
 0x52d   :  { %v4659_v54 = vpop.eup %4658  ;;  %4664 = vrcp.f32 %v924_v30 }
 0x52e   :  { %v936_v32 = vmul.f32 %v4659_v54, %v4645_v5  ;;  %v1249_v35 = vpop.permute.xlu0 %1248 }
 0x530   :  { %4315 = vmatmul.mubr.msk.f32.vlgmr.msra.gmra.mrb[6].mxu0 %vm249_vm2, %v936_v32 }
 0x531   :  { %4323 = vmatpush3.msra.mxu0 %v1097_v13  ;;  %4324 = vmatprep.mubr.msk.f32.mxu0 %vm4779_vm1, %v4778_v42 }
 0x532   :  { %4332 = vmatprep.subr.mxu0 %v4778_v42  ;;  %v1401_v40 = vpop.permute.xlu0 %1400 }
 0x535   :  { %v4661_v33 = vpop.eup %4660 }
 0x536   :  { %v938_v34 = vmul.f32 %v4661_v33, %v4649_v9  ;;  %v4663_v36 = vpop.eup %4662  ;;  %v1586_v9 = vld [vmem:[%s5601_s8 + $0x10] sm:$0xff] }
 0x537   :  { %v940_v37 = vmul.f32 %v4663_v36, %v5082_v2  ;;  %v4665_v38 = vpop.eup %4664  ;;  %v4548_v11 = vpack.c.bf16 %v1587_v10, %v1586_v9  ;;  %v1832_v10 = vld [vmem:[%s5607_s14] sm:$0xff] }
 0x538   :  { %4325 = vmatmul.mubr.msk.f32.vlgmr.msra.gmra.mrb[8].mxu0 %vm249_vm2, %v938_v34  ;;  %v942_v43 = vmul.f32 %v4665_v38, %v5087_v7  ;;  %v1585_v7 = vld [vmem:[%s5601_s8 + $0x8] sm:$0xff] }
 0x539   :  { %4333 = vmatpush3.msra.mxu0 %v1249_v35  ;;  %4334 = vmatprep.mubr.msk.f32.mxu0 %vm4779_vm1, %v4778_v42  ;;  %v4544_v8 = vpack.c.bf16 %v1585_v7, %v1584_v6 }
 0x53a   :  { %4342 = vmatprep.subr.mxu0 %v4778_v42 }
 0x53c   :  { %4335 = vmatmul.mubr.msk.f32.vlgmr.msra.gmra.mrb[10].mxu0 %vm249_vm2, %v940_v37 }
 0x53d   :  { %4343 = vmatpush3.msra.mxu0 %v1401_v40  ;;  %4344 = vmatprep.mubr.msk.f32.mxu0 %vm4779_vm1, %v4778_v42 }
 0x53e   :  { %4545 = vmatprep.subr.bf16.mxu0 %v4544_v8 }
 0x540   :  { %4345 = vmatmul.mubr.msk.f32.vlgmr.msra.gmra.mrb[12].mxu0 %vm249_vm2, %v942_v43 }
 0x541   :  { %4547 = vmatpush3.bf16.msra.mxu0 %v4544_v8 }
 0x542   :  { %4549 = vmatprep.subr.bf16.mxu0 %v4548_v11 }
 0x545   :  { %4551 = vmatpush3.bf16.msra.mxu0 %v4548_v11  ;;  %v1833_v11 = vld [vmem:[%s5607_s14 + $0x8] sm:$0xff] }
 0x547   :  { %v915_v45 = vpop.xlane.xlu1 %914 }
 0x548   :  { %4666 = vrcp.f32 %v915_v45 }
 0x54b   :  { %v921_v48 = vpop.xlane.xlu1 %920 }
 0x54c   :  { %4668 = vrcp.f32 %v921_v48 }
 0x54f   :  { %v927_v49 = vpop.xlane.xlu1 %926 }
 0x550   :  { %4670 = vrcp.f32 %v927_v49 }
 0x552   :  { %v4667_v46 = vpop.eup %4666 }
 0x553   :  { %v939_v53 = vmul.f32 %v4667_v46, %v4651_v20  ;;  %v1477_v57 = vpop.permute.xlu1 %1476  ;;  %v1723_v46 = vld [vmem:[%s5605_s12 + $0x8] sm:$0xff] }
 0x555   :  { %4330 = vmatmul.mubr.msk.f32.vlgmr.msra.gmra.mrb[14].mxu1 %vm249_vm2, %v939_v53 }
 0x556   :  { %v4669_v55 = vpop.eup %4668  ;;  %4338 = vmatpush3.msra.mxu1 %v1325_v44  ;;  %4339 = vmatprep.mubr.msk.f32.mxu1 %vm4779_vm1, %v4778_v42 }
 0x557   :  { %v941_v56 = vmul.f32 %v4669_v55, %v4653_v22  ;;  %4347 = vmatprep.subr.mxu1 %v4778_v42  ;;  %v1724_v55 = vld [vmem:[%s5605_s12 + $0x10] sm:$0xff] }
 0x559   :  { %4340 = vmatmul.mubr.msk.f32.vlgmr.msra.gmra.mrb[16].mxu1 %vm249_vm2, %v941_v56  ;;  %v1725_v56 = vld [vmem:[%s5605_s12 + $0x18] sm:$0xff] }
 0x55a   :  { %v4671_v58 = vpop.eup %4670  ;;  %4348 = vmatpush3.msra.mxu1 %v1477_v57  ;;  %4349 = vmatprep.mubr.msk.f32.mxu1 %vm4779_vm1, %v4778_v42  ;;  %v4556_v57 = vpack.c.bf16 %v1725_v56, %v1724_v55 }
 0x55b   :  { %v943_v59 = vmul.f32 %v4671_v58, %v5101_v24 }
 0x55d   :  { %4350 = vmatmul.mubr.msk.f32.vlgmr.msra.gmra.mrb[18].mxu1 %vm249_vm2, %v943_v59 }
 0x5f3   :  { %v1092_v60 = vpop.f32.mrb[12].mxu1 }
 0x5f4   :  { %v4321_v50 = vpop.f32.mrb[13].mxu1  ;;  %1553 = vrot.lane.b32.xlu0 %v1092_v60, %s5620_s28 }
 0x603   :  { %v1016_v61 = vpop.f32.mrb[6].mxu0 }
 0x604   :  { %v4316_v62 = vpop.f32.mrb[7].mxu0 }
 0x60b   :  { %v1168_v63 = vpop.f32.mrb[8].mxu0 }
 0x60c   :  { %1557 = vrot.lane.b32.xlu1 %v1168_v63, %s5618_s29  ;;  %v4326_v0 = vpop.f32.mrb[9].mxu0 }
 0x60d   :  { %v4055_v0 = vld [vmem:[%s5603_s10] ss:$0 sm:$0xff] }
 0x60f   :  { %v1320_v1 = vpop.f32.mrb[10].mxu0 }
 0x610   :  { %v4336_v2 = vpop.f32.mrb[11].mxu0 }
 0x611   :  { %v4056_v2 = vld [vmem:[%s5604_s11] ss:$0 sm:$0xff] }
 0x613   :  { %v1472_v3 = vpop.f32.mrb[12].mxu0 }
 0x614   :  { %v4346_v5 = vpop.f32.mrb[13].mxu0 }
 0x628   :  { %v1244_v12 = vpop.f32.mrb[14].mxu1 }
 0x629   :  { %v4331_v13 = vpop.f32.mrb[15].mxu1  ;;  %1561 = vrot.lane.b32.xlu1 %v1244_v12, %s5616_s0  ;;  %v4560_v12 = vpack.c.bf16 %v1833_v11, %v1832_v10 }
 0x62a   :  { %v1834_v13 = vld [vmem:[%s5607_s14 + $0x10] sm:$0xff] }
 0x62b   :  { %4561 = vmatprep.subr.bf16.mxu0 %v4560_v12 }
 0x62c   :  { %v1396_v14 = vpop.f32.mrb[16].mxu1 }
 0x62d   :  { %v4341_v15 = vpop.f32.mrb[17].mxu1  ;;  %1570 = vrot.lane.b32.xlu0 %v1396_v14, %s5620_s28  ;;  %v1835_v14 = vld [vmem:[%s5607_s14 + $0x18] sm:$0xff] }
 0x62e   :  { %v4564_v15 = vpack.c.bf16 %v1835_v14, %v1834_v13 }
 0x630   :  { %v1548_v16 = vpop.f32.mrb[18].mxu1 }
 0x631   :  { %v4351_v17 = vpop.f32.mrb[19].mxu1  ;;  %1578 = vrot.lane.b32.xlu1 %v1548_v16, %s5616_s0  ;;  %1574 = vrot.lane.b32.xlu0 %v1472_v3, %s5618_s29  ;;  %v1836_v16 = vld [vmem:[%s5607_s14 + $0x20] sm:$0xff]  ;;  %s5634_s29 = smov 8   ;;  %s5636_s0 = smov 24  }
 0x632   :  { %v1837_v17 = vld [vmem:[%s5607_s14 + $0x28] sm:$0xff] }
 0x666   :  { %v1554_v18 = vpop.permute.xlu0 %1553 }
 0x667   :  { %v1564_v20 = vsel %vm249_vm2, %v1016_v61, %v1554_v18  ;;  %v4568_v18 = vpack.c.bf16 %v1837_v17, %v1836_v16  ;;  %v4063_v16 = vld [vmem:[%s5609_s16] ss:$0 sm:$0xff] }
 0x67e   :  { %v1558_v52 = vpop.permute.xlu1 %1557 }
 0x67f   :  { %v1566_v21 = vsel %vm1565_vm3, %v1564_v20, %v1558_v52  ;;  %v1838_v52 = vld [vmem:[%s5607_s14 + $0x30] sm:$0xff]  ;;  %v1839_v20 = vld [vmem:[%s5607_s14 + $0x38] sm:$0xff] }
 0x69b   :  { %v1562_v22 = vpop.permute.xlu1 %1561 }
 0x69c   :  { %v1568_v23 = vsel %vm1567_vm4, %v1566_v21, %v1562_v22  ;;  %v4572_v21 = vpack.c.bf16 %v1839_v20, %v1838_v52  ;;  %v4057_v22 = vld [vmem:[%s5606_s13] ss:$0 sm:$0xff] }
 0x69d   :  { %4360 = vmatprep.mubr.msk.f32.mxu0 %vm83_vm0, %v1568_v23  ;;  %v4064_v20 = vld [vmem:[%s5610_s17] ss:$0 sm:$0xff] }
 0x69f   :  { %v1571_v24 = vpop.permute.xlu0 %1570 }
 0x6a0   :  { %v1581_v25 = vsel %vm249_vm2, %v1320_v1, %v1571_v24 }
 0x6a3   :  { %v1579_v47 = vpop.permute.xlu1 %1578  ;;  %v1575_v26 = vpop.permute.xlu0 %1574 }
 0x6a4   :  { %v1582_v51 = vsel %vm1565_vm3, %v1581_v25, %v1575_v26 }
 0x6a5   :  { %v1583_v27 = vsel %vm1567_vm4, %v1582_v51, %v1579_v47 }
 0x6a6   :  { %4361 = vmatmul.mubr.msk.f32.vlgmr.msra.gmra.mrb[14].mxu0 %vm83_vm0, %v1583_v27 }
 0x6a7   :  { %4563 = vmatpush3.bf16.msra.mxu0 %v4560_v12 }
 0x6a8   :  { %4565 = vmatprep.subr.bf16.mxu0 %v4564_v15 }
 0x6ab   :  { %4567 = vmatpush3.bf16.msra.mxu0 %v4564_v15 }
 0x6ac   :  { %4569 = vmatprep.subr.bf16.mxu0 %v4568_v18 }
 0x6af   :  { %4571 = vmatpush3.bf16.msra.mxu0 %v4568_v18 }
 0x6b0   :  { %4573 = vmatprep.subr.bf16.mxu0 %v4572_v21 }
 0x6b3   :  { %4575 = vmatpush3.bf16.msra.mxu0 %v4572_v21 }
 0x6b4   :  { %4414 = vmatprep.subr.mxu0 %v4778_v42 }
 0x779   :  { %v4362_v29 = vpop.f32.mrb[14].mxu0 }
 0x77a   :  { %v1673_v30 = vadd.f32 %v4362_v29, %v4052_v28  ;;  %v1667_v31 = vpop.f32.mrb[15].mxu0 }
 0x77b   :  { %v1668_v54 = vadd.f32 %v4052_v28, %v1667_v31 }
 0x77c   :  { %v1677_v32 = vadd.f32 %v1673_v30, %v4940_v41 }
 0x77d   :  { %v1676_v33 = vadd.f32 %v1668_v54, %v4936_v39  ;;  %v1722_v39 = vld [vmem:[%s5605_s12] sm:$0xff] }
 0x77e   :  { %v1683_v34 = vsel %vm83_vm0, %v1677_v32, 0.0  ;;  %v4552_v53 = vpack.c.bf16 %v1723_v46, %v1722_v39 }
 0x77f   :  { %1684 = vadd.xlane.f32.xlu1 %v1683_v34  ;;  %v1680_v35 = vsel %vm83_vm0, %v1676_v33, 0.0 }
 0x780   :  { %1681 = vadd.xlane.f32.xlu0 %v1680_v35  ;;  %4553 = vmatprep.subr.bf16.mxu1 %v4552_v53 }
 0x781   :  { %4555 = vmatpush3.bf16.msra.mxu1 %v4552_v53 }
 0x782   :  { %4557 = vmatprep.subr.bf16.mxu1 %v4556_v57 }
 0x785   :  { %4559 = vmatpush3.bf16.msra.mxu1 %v4556_v57 }
 0x80c   :  { %v1685_v36 = vpop.xlane.xlu1 %1684 }
 0x80d   :  { %v1687_v37 = vmul.f32 0.03125, %v1685_v36  ;;  %v1682_v38 = vpop.xlane.xlu0 %1681 }
 0x80e   :  { %v1686_v40 = vmul.f32 0.03125, %v1682_v38 }
 0x80f   :  { %v1689_v43 = vsub.f32 %v1677_v32, %v1687_v37 }
 0x810   :  { %v1688_v44 = vsub.f32 %v1676_v33, %v1686_v40 }
 0x811   :  { %v1691_v49 = vmul.f32 %v1689_v43, %v1689_v43 }
 0x812   :  { %v1690_v45 = vmul.f32 %v1688_v44, %v1688_v44 }
 0x813   :  { %v1695_v41 = vsel %vm83_vm0, %v1691_v49, 0.0 }
 0x814   :  { %v1692_v48 = vsel %vm83_vm0, %v1690_v45, 0.0  ;;  %v4060_v45 = vld [vmem:[%s5608_s15] ss:$0 sm:$0xff] }
 0x815   :  { %1693 = vadd.xlane.f32.xlu0 %v1692_v48 }
 0x819   :  { %1696 = vadd.xlane.f32.xlu0 %v1695_v41 }
 0x8a2   :  { %v1694_v58 = vpop.xlane.xlu0 %1693 }
 0x8a3   :  { %v1698_v59 = vmul.f32 0.03125, %v1694_v58 }
 0x8a5   :  { %v1700_v60 = vadd.f32 1e-12, %v1698_v59 }
 0x8a6   :  { %v1697_v50 = vpop.xlane.xlu0 %1696 }
 0x8a7   :  { %4672 = vrsqrt.f32 %v1700_v60  ;;  %v1699_v61 = vmul.f32 0.03125, %v1697_v50 }
 0x8a9   :  { %v1701_v62 = vadd.f32 1e-12, %v1699_v61 }
 0x8ab   :  { %4674 = vrsqrt.f32 %v1701_v62 }
 0x8b1   :  { %v4673_v63 = vpop.eup %4672 }
 0x8b2   :  { %v1704_v1 = vmul.f32 %v4673_v63, %v1688_v44 }
 0x8b4   :  { %v1712_v3 = vmul.f32 %v4055_v0, %v1704_v1 }
 0x8b5   :  { %v4675_v5 = vpop.eup %4674 }
 0x8b6   :  { %v1705_v6 = vmul.f32 %v4675_v5, %v1689_v43  ;;  %v1720_v7 = vadd.f32 %v4056_v2, %v1712_v3  ;;  %v4066_v3 = vld [vmem:[%s5599_s6 + $0x28] sm:$0xff] }
 0x8b8   :  { %v1713_v8 = vmul.f32 %v4055_v0, %v1705_v6  ;;  %4371 = vmatprep.mubr.msk.f32.mxu1 %vm83_vm0, %v1720_v7  ;;  %v4067_v6 = vld [vmem:[%s5599_s6 + $0x30] sm:$0xff] }
 0x8ba   :  { %v1721_v9 = vadd.f32 %v4056_v2, %v1713_v8  ;;  %v4065_v2 = vld [vmem:[%s5599_s6 + $0x20] sm:$0xff] }
 0x8bb   :  { %v4576_v5 = vpack.c.bf16 %v4066_v3, %v4065_v2 }
 0x8bc   :  { %4372 = vmatmul.mubr.msk.f32.vlgmr.msra.gmra.mrb[20].mxu1 %vm83_vm0, %v1721_v9 }
 0x8bd   :  { %4577 = vmatprep.subr.bf16.mxu1 %v4576_v5 }
 0x8be   :  { %4579 = vmatpush3.bf16.msra.mxu1 %v4576_v5 }
 0x98f   :  { %v4373_v23 = vpop.f32.mrb[20].mxu1 }
 0x990   :  { %v1811_v24 = vadd.f32 %v4373_v23, %v4057_v22  ;;  %v1805_v25 = vpop.f32.mrb[21].mxu1 }
 0x991   :  { %v1806_v47 = vadd.f32 %v4057_v22, %v1805_v25  ;;  %v4070_v25 = vld [vmem:[%s5600_s7 + $0x1] ss:$0 sm:$0xff] }
 0x992   :  { %v1817_v26 = vmul.f32 0.044715, %v1811_v24  ;;  %v1815_v40 = vmul.f32 0.5, %v1811_v24 }
 0x993   :  { %v1816_v51 = vmul.f32 0.044715, %v1806_v47  ;;  %v1814_v37 = vmul.f32 0.5, %v1806_v47 }
 0x994   :  { %v1819_v27 = vmul.f32 %v1817_v26, %v1811_v24 }
 0x995   :  { %v1818_v28 = vmul.f32 %v1816_v51, %v1806_v47 }
 0x996   :  { %v1821_v29 = vmul.f32 %v1819_v27, %v1811_v24 }
 0x997   :  { %v1820_v30 = vmul.f32 %v1818_v28, %v1806_v47 }
 0x998   :  { %v1823_v31 = vadd.f32 %v1821_v29, %v1811_v24 }
 0x999   :  { %v1822_v54 = vadd.f32 %v1820_v30, %v1806_v47 }
 0x99a   :  { %v1825_v32 = vmul.f32 0.7978845, %v1823_v31 }
 0x99b   :  { %v1824_v33 = vmul.f32 0.7978845, %v1822_v54 }
 0x99c   :  { %4676 = vtanh.f32 %v1825_v32 }
 0x99d   :  { %4678 = vtanh.f32 %v1824_v33 }
 0x9a6   :  { %v4677_v34 = vpop.eup %4676 }
 0x9a7   :  { %v4679_v35 = vpop.eup %4678  ;;  %v1829_v36 = vadd.f32 1.0, %v4677_v34 }
 0x9a8   :  { %v1828_v38 = vadd.f32 1.0, %v4679_v35 }
 0x9a9   :  { %v1831_v44 = vmul.f32 %v1829_v36, %v1815_v40 }
 0x9aa   :  { %v1830_v43 = vmul.f32 %v1828_v38, %v1814_v37 }
 0x9ac   :  { %4390 = vmatprep.mubr.msk.f32.mxu0 %vm1847_vm5, %v1830_v43 }
 0x9ad   :  { %4391 = vmatmul.mubr.msk.f32.vlgmr.msra.gmra.mrb[16].mxu0 %vm1847_vm5, %v1831_v44 }
 0x9ae   :  { %4416 = vmatprep.mubr.msk.f32.mxu0 %vm4779_vm1, %v4778_v42 }
 0xa80   :  { %v4392_v48 = vpop.f32.mrb[16].mxu0 }
 0xa81   :  { %v1926_v49 = vadd.f32 %v4392_v48, %v4060_v45  ;;  %v1920_v41 = vpop.f32.mrb[17].mxu0 }
 0xa82   :  { %v1921_v39 = vadd.f32 %v4060_v45, %v1920_v41 }
 0xa83   :  { %v1930_v46 = vadd.f32 %v1926_v49, %v1721_v9 }
 0xa84   :  { %v1929_v53 = vadd.f32 %v1921_v39, %v1720_v7  ;;  %v4068_v7 = vld [vmem:[%s5599_s6 + $0x38] sm:$0xff] }
 0xa85   :  { %v1936_v55 = vsel %vm83_vm0, %v1930_v46, 0.0  ;;  %v4580_v8 = vpack.c.bf16 %v4068_v7, %v4067_v6 }
 0xa86   :  { %1937 = vadd.xlane.f32.xlu1 %v1936_v55  ;;  %v1933_v56 = vsel %vm83_vm0, %v1929_v53, 0.0 }
 0xa87   :  { %1934 = vadd.xlane.f32.xlu0 %v1933_v56  ;;  %4581 = vmatprep.subr.bf16.mxu1 %v4580_v8 }
 0xa88   :  { %4583 = vmatpush3.bf16.msra.mxu1 %v4580_v8 }
 0xa89   :  { %4404 = vmatprep.subr.mxu1 %v4778_v42 }
 0xb13   :  { %v1938_v57 = vpop.xlane.xlu1 %1937 }
 0xb14   :  { %v1940_v58 = vmul.f32 0.03125, %v1938_v57  ;;  %v1935_v59 = vpop.xlane.xlu0 %1934 }
 0xb15   :  { %v1939_v60 = vmul.f32 0.03125, %v1935_v59 }
 0xb16   :  { %v1942_v50 = vsub.f32 %v1930_v46, %v1940_v58 }
 0xb17   :  { %v1941_v61 = vsub.f32 %v1929_v53, %v1939_v60 }
 0xb18   :  { %v1944_v62 = vmul.f32 %v1942_v50, %v1942_v50 }
 0xb19   :  { %v1943_v63 = vmul.f32 %v1941_v61, %v1941_v61 }
 0xb1a   :  { %v1948_v0 = vsel %vm83_vm0, %v1944_v62, 0.0 }
 0xb1b   :  { %1949 = vadd.xlane.f32.xlu1 %v1948_v0  ;;  %v1945_v1 = vsel %vm83_vm0, %v1943_v63, 0.0 }
 0xb1c   :  { %1946 = vadd.xlane.f32.xlu0 %v1945_v1 }
 0xba8   :  { %v1950_v9 = vpop.xlane.xlu1 %1949 }
 0xba9   :  { %v1952_v10 = vmul.f32 0.03125, %v1950_v9  ;;  %v1947_v11 = vpop.xlane.xlu0 %1946 }
 0xbaa   :  { %v1951_v12 = vmul.f32 0.03125, %v1947_v11 }
 0xbab   :  { %v1954_v13 = vadd.f32 1e-12, %v1952_v10 }
 0xbac   :  { %v1953_v14 = vadd.f32 1e-12, %v1951_v12 }
 0xbad   :  { %4680 = vrsqrt.f32 %v1954_v13 }
 0xbae   :  { %4682 = vrsqrt.f32 %v1953_v14 }
 0xbb7   :  { %v4681_v15 = vpop.eup %4680 }
 0xbb8   :  { %v4683_v17 = vpop.eup %4682  ;;  %v1958_v18 = vmul.f32 %v4681_v15, %v1942_v50 }
 0xbb9   :  { %v1957_v52 = vmul.f32 %v4683_v17, %v1941_v61 }
 0xbba   :  { %v1966_v21 = vmul.f32 %v4063_v16, %v1958_v18 }
 0xbbb   :  { %v1965_v22 = vmul.f32 %v4063_v16, %v1957_v52 }
 0xbbc   :  { %v5249_v24 = vadd.f32 %v4064_v20, %v1966_v21 }
 0xbbd   :  { %v5247_v23 = vadd.f32 %v4064_v20, %v1965_v22 }
 0xbbf   :  { %4401 = vmatprep.mubr.msk.f32.mxu1 %vm83_vm0, %v5247_v23 }
 0xbc0   :  { %4402 = vmatmul.mubr.msk.f32.vlgmr.msra.gmra.mrb[22].mxu1 %vm83_vm0, %v5249_v24 }
 0xbc1   :  { %4406 = vmatprep.mubr.msk.f32.mxu1 %vm4779_vm1, %v4778_v42 }
 0xc93   :  { %v4403_v47 = vpop.f32.mrb[22].mxu1 }
 0xc94   :  { %v2060_v26 = vpop.f32.mrb[23].mxu1  ;;  %v5266_v27 = vadd.f32 %v4403_v47, %v4070_v25 }
 0xc95   :  { %v5260_v51 = vadd.f32 %v4070_v25, %v2060_v26 }
 0xc97   :  { %2072 = vrot.lane.b32.xlu1 %v5260_v51, %s4780_s23  ;;  %2070 = vrot.lane.b32.xlu0 %v5260_v51, %s4781_s1 }
 0xc9b   :  { %2074 = vrot.lane.b32.xlu1 %v5260_v51, %s4782_s24  ;;  %2079 = vrot.lane.b32.xlu0 %v5266_v27, %s4780_s23 }
 0xc9f   :  { %2077 = vrot.lane.b32.xlu1 %v5266_v27, %s4781_s1  ;;  %2083 = vrot.lane.b32.xlu0 %v5260_v51, %s4783_s2 }
 0xca3   :  { %2081 = vrot.lane.b32.xlu1 %v5266_v27, %s4782_s24 }
 0xd09   :  { %v5278_v28 = vpop.permute.xlu1 %2072  ;;  %v5280_v29 = vpop.permute.xlu0 %2070 }
 0xd0a   :  { %2235 = vrot.lane.b32.xlu0 %v5278_v28, %s4783_s2  ;;  %2159 = vrot.lane.b32.xlu1 %v5280_v29, %s4783_s2 }
 0xd0d   :  { %v5286_v30 = vpop.permute.xlu1 %2074  ;;  %v5288_v31 = vpop.permute.xlu0 %2079 }
 0xd0e   :  { %2387 = vrot.lane.b32.xlu0 %v5266_v27, %s4783_s2  ;;  %2311 = vrot.lane.b32.xlu1 %v5286_v30, %s4783_s2 }
 0xd11   :  { %v5294_v54 = vpop.permute.xlu1 %2077  ;;  %v2084_v32 = vpop.permute.xlu0 %2083 }
 0xd12   :  { %2463 = vrot.lane.b32.xlu1 %v5294_v54, %s4783_s2  ;;  %2539 = vrot.lane.b32.xlu0 %v5288_v31, %s4783_s2 }
 0xd13   :  { %4405 = vmatpush3.xpose.msk.msra.mxu1 %vm249_vm2, %v2084_v32 }
 0xd14   :  { %4409 = vmatprep.subr.mxu1 %v4778_v42 }
 0xd15   :  { %v5302_v33 = vpop.permute.xlu1 %2081 }
 0xd16   :  { %4407 = vmatmul.mubr.msk.f32.vlgmr.msra.gmra.mrb[24].mxu1 %vm249_vm2, %v5260_v51  ;;  %2615 = vrot.lane.b32.xlu1 %v5302_v33, %s4783_s2 }
 0xd17   :  { %4411 = vmatprep.mubr.msk.f32.mxu1 %vm4779_vm1, %v4778_v42 }
 0xd7c   :  { %v2160_v34 = vpop.permute.xlu1 %2159  ;;  %v2236_v35 = vpop.permute.xlu0 %2235 }
 0xd7d   :  { %4410 = vmatpush3.xpose.msk.msra.mxu1 %vm249_vm2, %v2160_v34  ;;  %4415 = vmatpush3.xpose.msk.msra.mxu0 %vm249_vm2, %v2236_v35 }
 0xd7e   :  { %4419 = vmatprep.subr.mxu1 %v4778_v42  ;;  %4424 = vmatprep.subr.mxu0 %v4778_v42 }
 0xd80   :  { %v2312_v36 = vpop.permute.xlu1 %2311  ;;  %4412 = vmatmul.mubr.msk.f32.vlgmr.msra.gmra.mrb[26].mxu1 %vm249_vm2, %v5280_v29  ;;  %4417 = vmatmul.mubr.msk.f32.vlgmr.msra.gmra.mrb[18].mxu0 %vm249_vm2, %v5278_v28  ;;  %v2388_v37 = vpop.permute.xlu0 %2387 }
 0xd81   :  { %4420 = vmatpush3.xpose.msk.msra.mxu1 %vm249_vm2, %v2312_v36  ;;  %4425 = vmatpush3.xpose.msk.msra.mxu0 %vm249_vm2, %v2388_v37 }
 0xd82   :  { %4421 = vmatprep.mubr.msk.f32.mxu1 %vm4779_vm1, %v4778_v42  ;;  %4426 = vmatprep.mubr.msk.f32.mxu0 %vm4779_vm1, %v4778_v42 }
 0xd83   :  { %4429 = vmatprep.subr.mxu1 %v4778_v42  ;;  %4434 = vmatprep.subr.mxu0 %v4778_v42 }
 0xd84   :  { %v2464_v38 = vpop.permute.xlu1 %2463  ;;  %4422 = vmatmul.mubr.msk.f32.vlgmr.msra.gmra.mrb[28].mxu1 %vm249_vm2, %v5286_v30  ;;  %4427 = vmatmul.mubr.msk.f32.vlgmr.msra.gmra.mrb[20].mxu0 %vm249_vm2, %v5266_v27  ;;  %v2540_v40 = vpop.permute.xlu0 %2539 }
 0xd85   :  { %4430 = vmatpush3.xpose.msk.msra.mxu1 %vm249_vm2, %v2464_v38  ;;  %4435 = vmatpush3.xpose.msk.msra.mxu0 %vm249_vm2, %v2540_v40 }
 0xd86   :  { %4431 = vmatprep.mubr.msk.f32.mxu1 %vm4779_vm1, %v4778_v42  ;;  %4436 = vmatprep.mubr.msk.f32.mxu0 %vm4779_vm1, %v4778_v42 }
 0xd87   :  { %4439 = vmatprep.subr.mxu1 %v4778_v42  ;;  %4444 = vmatprep.subr.mxu0 %v4778_v42 }
 0xd88   :  { %v2616_v43 = vpop.permute.xlu1 %2615  ;;  %4432 = vmatmul.mubr.msk.f32.vlgmr.msra.gmra.mrb[30].mxu1 %vm249_vm2, %v5294_v54  ;;  %4437 = vmatmul.mubr.msk.f32.vlgmr.msra.gmra.mrb[22].mxu0 %vm249_vm2, %v5288_v31 }
 0xd89   :  { %4440 = vmatpush3.xpose.msk.msra.mxu1 %vm249_vm2, %v2616_v43  ;;  %4441 = vmatprep.mubr.msk.f32.mxu1 %vm4779_vm1, %v4778_v42 }
 0xd8a   :  { %4449 = vmatprep.subr.mxu1 %v4778_v42  ;;  %4446 = vmatprep.mubr.msk.f32.mxu0 %vm4779_vm1, %v4778_v42 }
 0xd8c   :  { %4442 = vmatmul.mubr.msk.f32.vlgmr.msra.gmra.mrb[32].mxu1 %vm249_vm2, %v5302_v33 }
 0xd8d   :  { %4451 = vmatprep.mubr.msk.f32.mxu1 %vm4779_vm1, %v4778_v42 }
 0xde9   :  { %v2155_v44 = vpop.f32.mrb[24].mxu1 }
 0xdea   :  { %v2156_v45 = vadd.f32 %v2155_v44, %v5048_v4  ;;  %v4408_v48 = vpop.f32.mrb[25].mxu1 }
 0xdec   :  { %v2691_v49 = vsel %vm249_vm2, %v2156_v45, -inf }
 0xded   :  { %2692 = vmax.xlane.f32.xlu0 %v2691_v49 }
 0xe53   :  { %v2231_v41 = vpop.f32.mrb[26].mxu1  ;;  %v2307_v39 = vpop.f32.mrb[18].mxu0 }
 0xe54   :  { %v2232_v46 = vadd.f32 %v2231_v41, %v5048_v4  ;;  %v2308_v53 = vadd.f32 %v2307_v39, %v5048_v4  ;;  %v4413_v55 = vpop.f32.mrb[27].mxu1  ;;  %v4418_v56 = vpop.f32.mrb[19].mxu0 }
 0xe56   :  { %v2694_v57 = vsel %vm249_vm2, %v2232_v46, -inf  ;;  %v2697_v58 = vsel %vm249_vm2, %v2308_v53, -inf }
 0xe57   :  { %2695 = vmax.xlane.f32.xlu1 %v2694_v57  ;;  %v2383_v59 = vpop.f32.mrb[28].mxu1  ;;  %2698 = vmax.xlane.f32.xlu0 %v2697_v58  ;;  %v2459_v60 = vpop.f32.mrb[20].mxu0 }
 0xe58   :  { %v2384_v50 = vadd.f32 %v2383_v59, %v5048_v4  ;;  %v4423_v61 = vpop.f32.mrb[29].mxu1  ;;  %v4428_v62 = vpop.f32.mrb[21].mxu0  ;;  %v2460_v63 = vadd.f32 %v2459_v60, %v5055_v19 }
 0xe5a   :  { %v2700_v0 = vsel %vm249_vm2, %v2384_v50, -inf  ;;  %v2703_v9 = vsel %vm249_vm2, %v2460_v63, -inf }
 0xe5b   :  { %v2535_v1 = vpop.f32.mrb[30].mxu1  ;;  %2701 = vmax.xlane.f32.xlu0 %v2700_v0  ;;  %v2611_v2 = vpop.f32.mrb[22].mxu0 }
 0xe5c   :  { %v2536_v3 = vadd.f32 %v2535_v1, %v5055_v19  ;;  %v4433_v5 = vpop.f32.mrb[31].mxu1  ;;  %v4438_v6 = vpop.f32.mrb[23].mxu0  ;;  %v2612_v7 = vadd.f32 %v2611_v2, %v5055_v19 }
 0xe5e   :  { %v2706_v8 = vsel %vm249_vm2, %v2536_v3, -inf  ;;  %v2709_v13 = vsel %vm249_vm2, %v2612_v7, -inf }
 0xe5f   :  { %2707 = vmax.xlane.f32.xlu1 %v2706_v8  ;;  %v2687_v4 = vpop.f32.mrb[32].mxu1  ;;  %2704 = vmax.xlane.f32.xlu0 %v2703_v9 }
 0xe60   :  { %v2688_v10 = vadd.f32 %v2687_v4, %v5055_v19  ;;  %v4443_v11 = vpop.f32.mrb[33].mxu1 }
 0xe62   :  { %v2712_v12 = vsel %vm249_vm2, %v2688_v10, -inf }
 0xe63   :  { %2713 = vmax.xlane.f32.xlu1 %v2712_v12  ;;  %2710 = vmax.xlane.f32.xlu0 %v2709_v13 }
 0xe74   :  { %2855 = vrot.lane.b32.xlu1 %v5280_v29, %s4784_s3 }
 0xe78   :  { %2931 = vrot.lane.b32.xlu1 %v5278_v28, %s4784_s3 }
 0xe79   :  { %2779 = vrot.lane.b32.xlu0 %v5260_v51, %s4784_s3 }
 0xe7a   :  { %v2693_v19 = vpop.xlane.xlu0 %2692 }
 0xe7b   :  { %v2715_v14 = vsub.f32 %v2156_v45, %v2693_v19 }
 0xe7c   :  { %3007 = vrot.lane.b32.xlu1 %v5286_v30, %s4784_s3 }
 0xe7d   :  { %3083 = vrot.lane.b32.xlu0 %v5266_v27, %s4784_s3  ;;  %v2723_v15 = vmul.f32 1.442695, %v2715_v14 }
 0xe7f   :  { %4684 = vpow2.f32 %v2723_v15 }
 0xe80   :  { %3159 = vrot.lane.b32.xlu1 %v5294_v54, %s4784_s3 }
 0xe89   :  { %v5380_v16 = vpop.eup %4684 }
 0xe8a   :  { %v2739_v17 = vsel %vm249_vm2, %v5380_v16, 0.0 }
 0xe9c   :  { %2740 = vadd.xlane.f32.xlu0 %v2739_v17 }
 0xee4   :  { %v2696_v18 = vpop.xlane.xlu1 %2695  ;;  %v2699_v52 = vpop.xlane.xlu0 %2698 }
 0xee5   :  { %v2716_v20 = vsub.f32 %v2232_v46, %v2696_v18  ;;  %v2717_v21 = vsub.f32 %v2308_v53, %v2699_v52 }
 0xee7   :  { %v2725_v22 = vmul.f32 1.442695, %v2716_v20  ;;  %v2727_v25 = vmul.f32 1.442695, %v2717_v21 }
 0xee8   :  { %v2702_v47 = vpop.xlane.xlu0 %2701 }
 0xee9   :  { %4686 = vpow2.f32 %v2725_v22  ;;  %v2718_v26 = vsub.f32 %v2384_v50, %v2702_v47 }
 0xeea   :  { %4688 = vpow2.f32 %v2727_v25 }
 0xeeb   :  { %v2729_v51 = vmul.f32 1.442695, %v2718_v26 }
 0xeec   :  { %v2708_v27 = vpop.xlane.xlu1 %2707  ;;  %v2705_v28 = vpop.xlane.xlu0 %2704 }
 0xeed   :  { %4690 = vpow2.f32 %v2729_v51  ;;  %v2720_v29 = vsub.f32 %v2536_v3, %v2708_v27  ;;  %v2719_v30 = vsub.f32 %v2460_v63, %v2705_v28  ;;  %v4097_v51 = vld [vmem:[%s5601_s8 + $0x20] sm:$0xff]  ;;  %v4098_v27 = vld [vmem:[%s5601_s8 + $0x28] sm:$0xff] }
 0xeee   :  { %v4584_v28 = vpack.c.bf16 %v4098_v27, %v4097_v51  ;;  %v4107_v27 = vld [vmem:[%s5603_s10 + $0x1] ss:$0 sm:$0xff] }
 0xeef   :  { %v2733_v54 = vmul.f32 1.442695, %v2720_v29  ;;  %v2731_v32 = vmul.f32 1.442695, %v2719_v30  ;;  %v4099_v29 = vld [vmem:[%s5601_s8 + $0x30] sm:$0xff]  ;;  %v4100_v30 = vld [vmem:[%s5601_s8 + $0x38] sm:$0xff] }
 0xef0   :  { %v2714_v34 = vpop.xlane.xlu1 %2713  ;;  %v2711_v35 = vpop.xlane.xlu0 %2710 }
 0xef1   :  { %4692 = vpow2.f32 %v2733_v54  ;;  %v2722_v36 = vsub.f32 %v2688_v10, %v2714_v34  ;;  %v2721_v37 = vsub.f32 %v2612_v7, %v2711_v35  ;;  %v4588_v54 = vpack.c.bf16 %v4100_v30, %v4099_v29  ;;  %v4108_v29 = vld [vmem:[%s5604_s11 + $0x1] ss:$0 sm:$0xff] }
 0xef2   :  { %4694 = vpow2.f32 %v2731_v32 }
 0xef3   :  { %v4687_v38 = vpop.eup %4686  ;;  %v2737_v40 = vmul.f32 1.442695, %v2722_v36  ;;  %v2735_v43 = vmul.f32 1.442695, %v2721_v37 }
 0xef4   :  { %v4689_v44 = vpop.eup %4688  ;;  %v2856_v45 = vpop.permute.xlu1 %2855  ;;  %v2742_v49 = vsel %vm249_vm2, %v4687_v38, 0.0 }
 0xef5   :  { %v2780_v48 = vpop.permute.xlu0 %2779  ;;  %4696 = vpow2.f32 %v2737_v40  ;;  %2743 = vadd.xlane.f32.xlu1 %v2742_v49  ;;  %4450 = vmatpush3.msra.mxu1 %v2856_v45  ;;  %v2745_v41 = vsel %vm249_vm2, %v4689_v44, 0.0 }
 0xef6   :  { %4698 = vpow2.f32 %v2735_v43  ;;  %2746 = vadd.xlane.f32.xlu0 %v2745_v41  ;;  %4445 = vmatpush3.msra.mxu0 %v2780_v48 }
 0xef7   :  { %v4691_v39 = vpop.eup %4690  ;;  %4454 = vmatprep.subr.mxu0 %v4778_v42  ;;  %4459 = vmatprep.subr.mxu1 %v4778_v42 }
 0xef8   :  { %v2748_v46 = vsel %vm249_vm2, %v4691_v39, 0.0  ;;  %v2932_v1 = vpop.permute.xlu1 %2931 }
 0xef9   :  { %2749 = vadd.xlane.f32.xlu1 %v2748_v46  ;;  %v3084_v61 = vpop.permute.xlu0 %3083 }
 0xefb   :  { %v4693_v53 = vpop.eup %4692 }
 0xefc   :  { %v4695_v55 = vpop.eup %4694  ;;  %v2754_v56 = vsel %vm249_vm2, %v4693_v53, 0.0  ;;  %v3008_v2 = vpop.permute.xlu1 %3007 }
 0xefd   :  { %2755 = vadd.xlane.f32.xlu1 %v2754_v56  ;;  %v2751_v57 = vsel %vm249_vm2, %v4695_v55, 0.0 }
 0xefe   :  { %2752 = vadd.xlane.f32.xlu0 %v2751_v57 }
 0xeff   :  { %v5391_v58 = vpop.eup %4696 }
 0xf00   :  { %v5393_v59 = vpop.eup %4698  ;;  %v2760_v60 = vsel %vm249_vm2, %v5391_v58, 0.0 }
 0xf01   :  { %2761 = vadd.xlane.f32.xlu1 %v2760_v60  ;;  %v2757_v50 = vsel %vm249_vm2, %v5393_v59, 0.0 }
 0xf02   :  { %2758 = vadd.xlane.f32.xlu0 %v2757_v50 }
 0xf12   :  { %3311 = vrot.lane.b32.xlu1 %v5302_v33, %s4784_s3  ;;  %v3160_v33 = vpop.permute.xlu1 %3159 }
 0xf18   :  { %3235 = vrot.lane.b32.xlu0 %v5288_v31, %s4784_s3 }
 0xf29   :  { %v2741_v62 = vpop.xlane.xlu0 %2740 }
 0xf2a   :  { %4700 = vrcp.f32 %v2741_v62 }
 0xf34   :  { %v4701_v63 = vpop.eup %4700 }
 0xf35   :  { %v2771_v0 = vmul.f32 %v4701_v63, %v5380_v16 }
 0xf37   :  { %4447 = vmatmul.mubr.msk.f32.vlgmr.msra.gmra.mrb[24].mxu0 %vm249_vm2, %v2771_v0  ;;  %v4102_v0 = vld [vmem:[%s5602_s9 + $0x1] ss:$0 sm:$0xff] }
 0xf38   :  { %4455 = vmatpush3.msra.mxu0 %v2932_v1  ;;  %4456 = vmatprep.mubr.msk.f32.mxu0 %vm4779_vm1, %v4778_v42 }
 0xf39   :  { %4464 = vmatprep.subr.mxu0 %v4778_v42 }
 0xf82   :  { %v2744_v3 = vpop.xlane.xlu1 %2743 }
 0xf83   :  { %4702 = vrcp.f32 %v2744_v3  ;;  %v2747_v31 = vpop.xlane.xlu0 %2746 }
 0xf84   :  { %4704 = vrcp.f32 %v2747_v31 }
 0xf86   :  { %v2750_v5 = vpop.xlane.xlu1 %2749 }
 0xf87   :  { %4706 = vrcp.f32 %v2750_v5 }
 0xf8a   :  { %v2756_v6 = vpop.xlane.xlu1 %2755 }
 0xf8b   :  { %4708 = vrcp.f32 %v2756_v6  ;;  %v2753_v7 = vpop.xlane.xlu0 %2752 }
 0xf8c   :  { %4710 = vrcp.f32 %v2753_v7 }
 0xf8d   :  { %v4703_v8 = vpop.eup %4702 }
 0xf8e   :  { %v4705_v9 = vpop.eup %4704  ;;  %v2772_v4 = vmul.f32 %v4703_v8, %v4687_v38  ;;  %v2762_v10 = vpop.xlane.xlu1 %2761 }
 0xf8f   :  { %v2773_v11 = vmul.f32 %v4705_v9, %v4689_v44  ;;  %4712 = vrcp.f32 %v2762_v10  ;;  %v2759_v12 = vpop.xlane.xlu0 %2758 }
 0xf90   :  { %4714 = vrcp.f32 %v2759_v12  ;;  %4452 = vmatmul.mubr.msk.f32.vlgmr.msra.gmra.mrb[34].mxu1 %vm249_vm2, %v2772_v4 }
 0xf91   :  { %v4707_v13 = vpop.eup %4706  ;;  %4457 = vmatmul.mubr.msk.f32.vlgmr.msra.gmra.mrb[26].mxu0 %vm249_vm2, %v2773_v11  ;;  %4460 = vmatpush3.msra.mxu1 %v3008_v2 }
 0xf92   :  { %v2774_v19 = vmul.f32 %v4707_v13, %v4691_v39  ;;  %4465 = vmatpush3.msra.mxu0 %v3084_v61  ;;  %4461 = vmatprep.mubr.msk.f32.mxu1 %vm4779_vm1, %v4778_v42  ;;  %v3312_v18 = vpop.permute.xlu1 %3311 }
 0xf93   :  { %4469 = vmatprep.subr.mxu1 %v4778_v42  ;;  %4466 = vmatprep.mubr.msk.f32.mxu0 %vm4779_vm1, %v4778_v42  ;;  %v3236_v20 = vpop.permute.xlu0 %3235 }
 0xf94   :  { %4462 = vmatmul.mubr.msk.f32.vlgmr.msra.gmra.mrb[36].mxu1 %vm249_vm2, %v2774_v19  ;;  %4474 = vmatprep.subr.mxu0 %v4778_v42 }
 0xf95   :  { %v4709_v14 = vpop.eup %4708  ;;  %4470 = vmatpush3.msra.mxu1 %v3160_v33  ;;  %4471 = vmatprep.mubr.msk.f32.mxu1 %vm4779_vm1, %v4778_v42 }
 0xf96   :  { %v4711_v15 = vpop.eup %4710  ;;  %v2776_v16 = vmul.f32 %v4709_v14, %v4693_v53  ;;  %4479 = vmatprep.subr.mxu1 %v4778_v42 }
 0xf97   :  { %v2775_v17 = vmul.f32 %v4711_v15, %v4695_v55  ;;  %v4110_v15 = vld [vmem:[%s5605_s12 + $0x28] sm:$0xff] }
 0xf98   :  { %4472 = vmatmul.mubr.msk.f32.vlgmr.msra.gmra.mrb[38].mxu1 %vm249_vm2, %v2776_v16 }
 0xf99   :  { %v4713_v52 = vpop.eup %4712  ;;  %4467 = vmatmul.mubr.msk.f32.vlgmr.msra.gmra.mrb[28].mxu0 %vm249_vm2, %v2775_v17  ;;  %4480 = vmatpush3.msra.mxu1 %v3312_v18  ;;  %v4111_v17 = vld [vmem:[%s5605_s12 + $0x30] sm:$0xff]  ;;  %v4112_v18 = vld [vmem:[%s5605_s12 + $0x38] sm:$0xff] }
 0xf9a   :  { %v4715_v21 = vpop.eup %4714  ;;  %v2778_v22 = vmul.f32 %v4713_v52, %v5391_v58  ;;  %4475 = vmatpush3.msra.mxu0 %v3236_v20  ;;  %4476 = vmatprep.mubr.msk.f32.mxu0 %vm4779_vm1, %v4778_v42  ;;  %v4596_v52 = vpack.c.bf16 %v4112_v18, %v4111_v17 }
 0xf9b   :  { %v2777_v25 = vmul.f32 %v4715_v21, %v5393_v59  ;;  %4481 = vmatprep.mubr.msk.f32.mxu1 %vm4779_vm1, %v4778_v42  ;;  %4585 = vmatprep.subr.bf16.mxu0 %v4584_v28 }
 0xf9c   :  { %4482 = vmatmul.mubr.msk.f32.vlgmr.msra.gmra.mrb[40].mxu1 %vm249_vm2, %v2778_v22 }
 0xf9d   :  { %4477 = vmatmul.mubr.msk.f32.vlgmr.msra.gmra.mrb[30].mxu0 %vm249_vm2, %v2777_v25 }
 0xf9e   :  { %4587 = vmatpush3.bf16.msra.mxu0 %v4584_v28 }
 0xf9f   :  { %4589 = vmatprep.subr.bf16.mxu0 %v4588_v54 }
 0xfa2   :  { %4591 = vmatpush3.bf16.msra.mxu0 %v4588_v54 }
0x100a   :  { %v2851_v47 = vpop.f32.mrb[24].mxu0 }
0x100b   :  { %v4448_v26 = vpop.f32.mrb[25].mxu0 }
0x1063   :  { %v2927_v32 = vpop.f32.mrb[34].mxu1 }
0x1064   :  { %v3003_v34 = vpop.f32.mrb[26].mxu0  ;;  %v4453_v35 = vpop.f32.mrb[35].mxu1  ;;  %3388 = vrot.lane.b32.xlu0 %v2927_v32, %s5634_s29 }
0x1065   :  { %3392 = vrot.lane.b32.xlu1 %v3003_v34, %s5635_s25  ;;  %v4458_v36 = vpop.f32.mrb[27].mxu0 }
0x1067   :  { %v3079_v37 = vpop.f32.mrb[36].mxu1 }
0x1068   :  { %v4463_v38 = vpop.f32.mrb[37].mxu1 }
0x1069   :  { %3396 = vrot.lane.b32.xlu1 %v3079_v37, %s5636_s0  ;;  %v4117_v37 = vld [vmem:[%s5607_s14 + $0x40] sm:$0xff]  ;;  %v4118_v38 = vld [vmem:[%s5607_s14 + $0x48] sm:$0xff] }
0x106b   :  { %v3231_v40 = vpop.f32.mrb[38].mxu1 }
0x106c   :  { %v3155_v43 = vpop.f32.mrb[28].mxu0  ;;  %v4473_v44 = vpop.f32.mrb[39].mxu1  ;;  %3403 = vrot.lane.b32.xlu0 %v3231_v40, %s5634_s29  ;;  %v4600_v40 = vpack.c.bf16 %v4118_v38, %v4117_v37 }
0x106d   :  { %v4468_v45 = vpop.f32.mrb[29].mxu0  ;;  %v4120_v44 = vld [vmem:[%s5607_s14 + $0x58] sm:$0xff] }
0x106e   :  { %4601 = vmatprep.subr.bf16.mxu0 %v4600_v40 }
0x106f   :  { %v3383_v48 = vpop.f32.mrb[40].mxu1 }
0x1070   :  { %v3307_v49 = vpop.f32.mrb[30].mxu0  ;;  %v4483_v41 = vpop.f32.mrb[41].mxu1  ;;  %3411 = vrot.lane.b32.xlu1 %v3383_v48, %s5636_s0  ;;  %v4122_v48 = vld [vmem:[%s5607_s14 + $0x68] sm:$0xff] }
0x1071   :  { %3407 = vrot.lane.b32.xlu0 %v3307_v49, %s5635_s25  ;;  %v4478_v39 = vpop.f32.mrb[31].mxu0  ;;  %v4123_v41 = vld [vmem:[%s5607_s14 + $0x70] sm:$0xff] }
0x1072   :  { %v4124_v39 = vld [vmem:[%s5607_s14 + $0x78] sm:$0xff] }
0x10d6   :  { %v3389_v46 = vpop.permute.xlu0 %3388 }
0x10d7   :  { %v3393_v53 = vpop.permute.xlu1 %3392  ;;  %v3399_v55 = vsel %vm249_vm2, %v2851_v47, %v3389_v46  ;;  %v4612_v46 = vpack.c.bf16 %v4124_v39, %v4123_v41 }
0x10d8   :  { %v3400_v57 = vsel %vm1565_vm3, %v3399_v55, %v3393_v53  ;;  %v4114_v53 = vld [vmem:[%s5606_s13 + $0x1] ss:$0 sm:$0xff] }
0x10db   :  { %v3397_v56 = vpop.permute.xlu1 %3396 }
0x10dc   :  { %v3401_v58 = vsel %vm1567_vm4, %v3400_v57, %v3397_v56 }
0x10dd   :  { %4492 = vmatprep.mubr.msk.f32.mxu0 %vm83_vm0, %v3401_v58 }
0x10de   :  { %v3404_v59 = vpop.permute.xlu0 %3403 }
0x10df   :  { %v3414_v50 = vsel %vm249_vm2, %v3155_v43, %v3404_v59  ;;  %v4119_v43 = vld [vmem:[%s5607_s14 + $0x50] sm:$0xff] }
0x10e0   :  { %v4604_v45 = vpack.c.bf16 %v4120_v44, %v4119_v43  ;;  %v4131_v44 = vld [vmem:[%s5609_s16 + $0x1] ss:$0 sm:$0xff]  ;;  %s4790_s16 = smov [#allocation2]  }
0x10e2   :  { %v3412_v60 = vpop.permute.xlu1 %3411 }
0x10e3   :  { %v3408_v61 = vpop.permute.xlu0 %3407 }
0x10e4   :  { %v3415_v62 = vsel %vm1565_vm3, %v3414_v50, %v3408_v61 }
0x10e5   :  { %v3416_v63 = vsel %vm1567_vm4, %v3415_v62, %v3412_v60 }
0x10e6   :  { %4493 = vmatmul.mubr.msk.f32.vlgmr.msra.gmra.mrb[32].mxu0 %vm83_vm0, %v3416_v63 }
0x10e7   :  { %4603 = vmatpush3.bf16.msra.mxu0 %v4600_v40 }
0x10e8   :  { %4605 = vmatprep.subr.bf16.mxu0 %v4604_v45 }
0x10eb   :  { %4607 = vmatpush3.bf16.msra.mxu0 %v4604_v45 }
0x11b9   :  { %v4494_v1 = vpop.f32.mrb[32].mxu0 }
0x11ba   :  { %v3508_v2 = vadd.f32 %v4494_v1, %v4102_v0  ;;  %v3502_v33 = vpop.f32.mrb[33].mxu0 }
0x11bb   :  { %v3503_v3 = vadd.f32 %v4102_v0, %v3502_v33 }
0x11bc   :  { %v3512_v31 = vadd.f32 %v3508_v2, %v5249_v24 }
0x11bd   :  { %v3511_v5 = vadd.f32 %v3503_v3, %v5247_v23  ;;  %v4109_v23 = vld [vmem:[%s5605_s12 + $0x20] sm:$0xff] }
0x11be   :  { %v3520_v6 = vsel %vm83_vm0, %v3512_v31, 0.0  ;;  %v4592_v16 = vpack.c.bf16 %v4110_v15, %v4109_v23 }
0x11bf   :  { %3521 = vadd.xlane.f32.xlu1 %v3520_v6  ;;  %v3517_v7 = vsel %vm83_vm0, %v3511_v5, 0.0 }
0x11c0   :  { %3518 = vadd.xlane.f32.xlu0 %v3517_v7  ;;  %4593 = vmatprep.subr.bf16.mxu1 %v4592_v16 }
0x11c1   :  { %4595 = vmatpush3.bf16.msra.mxu1 %v4592_v16 }
0x11c2   :  { %4597 = vmatprep.subr.bf16.mxu1 %v4596_v52 }
0x11c5   :  { %4599 = vmatpush3.bf16.msra.mxu1 %v4596_v52 }
0x124c   :  { %v3522_v8 = vpop.xlane.xlu1 %3521 }
0x124d   :  { %v3524_v9 = vmul.f32 0.03125, %v3522_v8  ;;  %v3519_v4 = vpop.xlane.xlu0 %3518 }
0x124e   :  { %v3523_v10 = vmul.f32 0.03125, %v3519_v4 }
0x124f   :  { %v3526_v11 = vsub.f32 %v3512_v31, %v3524_v9 }
0x1250   :  { %v3525_v12 = vsub.f32 %v3511_v5, %v3523_v10  ;;  %v4126_v10 = vld [vmem:[%s5608_s15 + $0x1] ss:$0 sm:$0xff] }
0x1251   :  { %v3528_v14 = vmul.f32 %v3526_v11, %v3526_v11 }
0x1252   :  { %v3527_v13 = vmul.f32 %v3525_v12, %v3525_v12 }
0x1253   :  { %v3532_v24 = vsel %vm83_vm0, %v3528_v14, 0.0 }
0x1254   :  { %v3529_v19 = vsel %vm83_vm0, %v3527_v13, 0.0 }
0x1255   :  { %3530 = vadd.xlane.f32.xlu0 %v3529_v19 }
0x1259   :  { %3533 = vadd.xlane.f32.xlu0 %v3532_v24 }
0x12e2   :  { %v3531_v20 = vpop.xlane.xlu0 %3530 }
0x12e3   :  { %v3535_v21 = vmul.f32 0.03125, %v3531_v20 }
0x12e5   :  { %v3537_v22 = vadd.f32 1e-12, %v3535_v21 }
0x12e6   :  { %v3534_v25 = vpop.xlane.xlu0 %3533 }
0x12e7   :  { %4716 = vrsqrt.f32 %v3537_v22  ;;  %v3536_v47 = vmul.f32 0.03125, %v3534_v25 }
0x12e9   :  { %v3538_v26 = vadd.f32 1e-12, %v3536_v47 }
0x12eb   :  { %4718 = vrsqrt.f32 %v3538_v26 }
0x12f1   :  { %v4717_v51 = vpop.eup %4716 }
0x12f2   :  { %v3541_v28 = vmul.f32 %v4717_v51, %v3525_v12  ;;  %v3907_v51 = vld [vmem:[%s5611_s18] sm:$0xff] }
0x12f4   :  { %v3549_v30 = vmul.f32 %v4107_v27, %v3541_v28 }
0x12f5   :  { %v4719_v54 = vpop.eup %4718 }
0x12f6   :  { %v3542_v32 = vmul.f32 %v4719_v54, %v3526_v11  ;;  %v3557_v34 = vadd.f32 %v4108_v29, %v3549_v30  ;;  %v3909_v30 = vld [vmem:[%s5611_s18 + $0x10] sm:$0xff]  ;;  %v3910_v54 = vld [vmem:[%s5611_s18 + $0x18] sm:$0xff] }
0x12f8   :  { %v3550_v35 = vmul.f32 %v4107_v27, %v3542_v32  ;;  %4503 = vmatprep.mubr.msk.f32.mxu1 %vm83_vm0, %v3557_v34  ;;  %v3908_v27 = vld [vmem:[%s5611_s18 + $0x8] sm:$0xff]  ;;  %v4620_v32 = vpack.c.bf16 %v3910_v54, %v3909_v30  ;;  %s4789_s18 = smov 32  }
0x12f9   :  { %v4617_v28 = vpack.c.bf16 %v3908_v27, %v3907_v51 }
0x12fa   :  { %v3558_v36 = vadd.f32 %v4108_v29, %v3550_v35  ;;  %v4788_v29 = vmov 0.0|0.0  }
0x12fb   :  { %4616 = vmatprep.subr.bf16.mxu1 %v4788_v29 }
0x12fc   :  { %4504 = vmatmul.mubr.msk.f32.vlgmr.msra.gmra.mrb[42].mxu1 %vm83_vm0, %v3558_v36 }
0x12fd   :  { %4533 = vmatprep.mubr.msk.f32.mxu1 %vm4779_vm1, %v4778_v42  ;;  %v4121_v42 = vld [vmem:[%s5607_s14 + $0x60] sm:$0xff]  ;;  %4618 = vmatpush3.bf16.msra.mxu1 %v4617_v28 }
0x12fe   :  { %v4608_v49 = vpack.c.bf16 %v4122_v48, %v4121_v42  ;;  %4619 = vmatprep.subr.bf16.mxu1 %v4788_v29  ;;  %v4132_v48 = vld [vmem:[%s5610_s17 + $0x1] ss:$0 sm:$0xff]  ;;  %s4000_s17 = sshll.u32 %s4790_s16, 4  ;;  %s4001_s17 = int_to_ptr.vmem [resolvable:$true] %s4000_s17 }
0x12ff   :  { %p4735_p1 = scmp.lt.s32.totalorder %s4001_s17, %s4001_s17 }
0x1300   :  { %4609 = vmatprep.subr.bf16.mxu0 %v4608_v49 }
0x1301   :  { %4611 = vmatpush3.bf16.msra.mxu0 %v4608_v49  ;;  %4621 = vmatpush3.bf16.msra.mxu1 %v4620_v32 }
0x1302   :  { %4613 = vmatprep.subr.bf16.mxu0 %v4612_v46 }
0x1305   :  { %4615 = vmatpush3.bf16.msra.mxu0 %v4612_v46 }
0x13cf   :  { %v4505_v55 = vpop.f32.mrb[42].mxu1 }
0x13d0   :  { %v3650_v56 = vadd.f32 %v4505_v55, %v4114_v53  ;;  %v3644_v57 = vpop.f32.mrb[43].mxu1 }
0x13d1   :  { %v3645_v58 = vadd.f32 %v4114_v53, %v3644_v57 }
0x13d2   :  { %v3656_v59 = vmul.f32 0.044715, %v3650_v56  ;;  %v3654_v8 = vmul.f32 0.5, %v3650_v56 }
0x13d3   :  { %v3655_v60 = vmul.f32 0.044715, %v3645_v58  ;;  %v3653_v6 = vmul.f32 0.5, %v3645_v58 }
0x13d4   :  { %v3658_v50 = vmul.f32 %v3656_v59, %v3650_v56 }
0x13d5   :  { %v3657_v61 = vmul.f32 %v3655_v60, %v3645_v58 }
0x13d6   :  { %v3660_v62 = vmul.f32 %v3658_v50, %v3650_v56 }
0x13d7   :  { %v3659_v63 = vmul.f32 %v3657_v61, %v3645_v58 }
0x13d8   :  { %v3662_v0 = vadd.f32 %v3660_v62, %v3650_v56 }
0x13d9   :  { %v3661_v1 = vadd.f32 %v3659_v63, %v3645_v58 }
0x13da   :  { %v3664_v2 = vmul.f32 0.7978845, %v3662_v0 }
0x13db   :  { %v3663_v33 = vmul.f32 0.7978845, %v3661_v1 }
0x13dc   :  { %4720 = vtanh.f32 %v3664_v2 }
0x13dd   :  { %4722 = vtanh.f32 %v3663_v33 }
0x13e6   :  { %v4721_v3 = vpop.eup %4720 }
0x13e7   :  { %v4723_v31 = vpop.eup %4722  ;;  %v3668_v5 = vadd.f32 1.0, %v4721_v3 }
0x13e8   :  { %v3667_v7 = vadd.f32 1.0, %v4723_v31 }
0x13e9   :  { %v3670_v4 = vmul.f32 %v3668_v5, %v3654_v8 }
0x13ea   :  { %v3669_v9 = vmul.f32 %v3667_v7, %v3653_v6 }
0x13ec   :  { %4522 = vmatprep.mubr.msk.f32.mxu0 %vm1847_vm5, %v3669_v9 }
0x13ed   :  { %4523 = vmatmul.mubr.msk.f32.vlgmr.msra.gmra.mrb[34].mxu0 %vm1847_vm5, %v3670_v4 }
0x14c0   :  { %v4524_v11 = vpop.f32.mrb[34].mxu0 }
0x14c1   :  { %v3766_v12 = vadd.f32 %v4524_v11, %v4126_v10  ;;  %v3760_v13 = vpop.f32.mrb[35].mxu0 }
0x14c2   :  { %v3761_v19 = vadd.f32 %v4126_v10, %v3760_v13 }
0x14c3   :  { %v3770_v14 = vadd.f32 %v3766_v12, %v3558_v36 }
0x14c4   :  { %v3769_v24 = vadd.f32 %v3761_v19, %v3557_v34 }
0x14c5   :  { %v3778_v23 = vsel %vm83_vm0, %v3770_v14, 0.0 }
0x14c6   :  { %3779 = vadd.xlane.f32.xlu0 %v3778_v23  ;;  %v3775_v15 = vsel %vm83_vm0, %v3769_v24, 0.0 }
0x14c7   :  { %3776 = vadd.xlane.f32.xlu1 %v3775_v15 }
0x1553   :  { %v3780_v16 = vpop.xlane.xlu0 %3779 }
0x1554   :  { %v3782_v17 = vmul.f32 0.03125, %v3780_v16  ;;  %v3777_v18 = vpop.xlane.xlu1 %3776 }
0x1555   :  { %v3781_v52 = vmul.f32 0.03125, %v3777_v18 }
0x1556   :  { %v3784_v20 = vsub.f32 %v3770_v14, %v3782_v17 }
0x1557   :  { %v3783_v21 = vsub.f32 %v3769_v24, %v3781_v52 }
0x1558   :  { %v3786_v22 = vmul.f32 %v3784_v20, %v3784_v20 }
0x1559   :  { %v3785_v25 = vmul.f32 %v3783_v21, %v3783_v21 }
0x155a   :  { %v3790_v47 = vsel %vm83_vm0, %v3786_v22, 0.0 }
0x155b   :  { %3791 = vadd.xlane.f32.xlu0 %v3790_v47  ;;  %v3787_v26 = vsel %vm83_vm0, %v3785_v25, 0.0 }
0x155c   :  { %3788 = vadd.xlane.f32.xlu1 %v3787_v26 }
0x15e8   :  { %v3792_v34 = vpop.xlane.xlu0 %3791 }
0x15e9   :  { %v3794_v35 = vmul.f32 0.03125, %v3792_v34  ;;  %v3789_v36 = vpop.xlane.xlu1 %3788 }
0x15ea   :  { %v3793_v37 = vmul.f32 0.03125, %v3789_v36 }
0x15eb   :  { %v3796_v38 = vadd.f32 1e-12, %v3794_v35 }
0x15ec   :  { %v3795_v40 = vadd.f32 1e-12, %v3793_v37 }
0x15ed   :  { %4724 = vrsqrt.f32 %v3796_v38 }
0x15ee   :  { %4726 = vrsqrt.f32 %v3795_v40 }
0x15f7   :  { %v4725_v43 = vpop.eup %4724 }
0x15f8   :  { %v4727_v45 = vpop.eup %4726  ;;  %v3800_v42 = vmul.f32 %v4725_v43, %v3784_v20 }
0x15f9   :  { %v3799_v49 = vmul.f32 %v4727_v45, %v3783_v21 }
0x15fa   :  { %v3808_v41 = vmul.f32 %v4131_v44, %v3800_v42 }
0x15fb   :  { %v3807_v39 = vmul.f32 %v4131_v44, %v3799_v49 }
0x15fc   :  { %v3816_v46 = vadd.f32 %v4132_v48, %v3808_v41 }
0x15fd   :  { %v3815_v53 = vadd.f32 %v4132_v48, %v3807_v39 }
0x15fe   :  { %v3852_v55 = vrot.slane %v3816_v46, 1  ;;  %v3866_v56 = vrot.slane %v3816_v46, 5  ;;  %v3874_v57 = vrot.slane %v3816_v46, 7  ;;  %v3860_v59 = vrot.slane %v3816_v46, 3 }
0x15ff   :  { %v3856_v60 = vrot.slane %v3816_v46, 2  ;;  %v3870_v50 = vrot.slane %v3816_v46, 6  ;;  %v3818_v61 = vrot.slane %v3815_v53, 1  ;;  %v3822_v62 = vrot.slane %v3815_v53, 2 }
0x1600   :  { %3853 = vrot.lane.b32.xlu0 %v3852_v55, %s4789_s18  ;;  %3867 = vrot.lane.b32.xlu1 %v3866_v56, %s4789_s18  ;;  %v3906_v58 = vsel %vm3890_vm6, %v3815_v53, %v3874_v57  ;;  %v3832_v63 = vrot.slane %v3815_v53, 5  ;;  %v3826_v0 = vrot.slane %v3815_v53, 3  ;;  %v3836_v1 = vrot.slane %v3815_v53, 6 }
0x1601   :  { %4534 = vmatmul.mubr.msk.f32.vlgmr.msra.gmra.mrb[44].mxu1 %vm83_vm0, %v3906_v58  ;;  %v3840_v2 = vrot.slane %v3815_v53, 7  ;;  %v3864_v11 = vrot.slane %v3816_v46, 4  ;;  %v3830_v17 = vrot.slane %v3815_v53, 4 }
0x1604   :  { %3861 = vrot.lane.b32.xlu0 %v3860_v59, %s4783_s2  ;;  %3857 = vrot.lane.b32.xlu1 %v3856_v60, %s4784_s3 }
0x1608   :  { %3871 = vrot.lane.b32.xlu1 %v3870_v50, %s4784_s3  ;;  %3819 = vrot.lane.b32.xlu0 %v3818_v61, %s4789_s18 }
0x160c   :  { %3875 = vrot.lane.b32.xlu1 %v3874_v57, %s4783_s2  ;;  %3823 = vrot.lane.b32.xlu0 %v3822_v62, %s4784_s3 }
0x1610   :  { %3833 = vrot.lane.b32.xlu1 %v3832_v63, %s4789_s18  ;;  %3827 = vrot.lane.b32.xlu0 %v3826_v0, %s4783_s2 }
0x1614   :  { %3837 = vrot.lane.b32.xlu1 %v3836_v1, %s4784_s3 }
0x1618   :  { %3841 = vrot.lane.b32.xlu1 %v3840_v2, %s4783_s2  ;;  %s4730_s2 = scalar_lea.vmem %s4001_s17, 64 }
0x1619   :  { %p4731_p0 = scmp.ne.s32.totalorder %s4001_s17, %s4730_s2  ;;  %p4736_p2 = scmp.lt.s32.totalorder %s4730_s2, %s4730_s2 }
0x161b   :  { %p4737_p3 = por %p4736_p2, %p4735_p1 }
0x161d   :  { %p4738_p4 = pnand %p4737_p3, %p4731_p0 }
0x1672   :  { %v3854_v33 = vpop.permute.xlu0 %3853  ;;  %v3868_v3 = vpop.permute.xlu1 %3867 }
0x1673   :  { %v3878_v10 = vsel %vm83_vm0, %v3816_v46, %v3854_v33  ;;  %v3881_v13 = vsel %vm83_vm0, %v3864_v11, %v3868_v3 }
0x1676   :  { %v3862_v31 = vpop.permute.xlu0 %3861  ;;  %v3858_v5 = vpop.permute.xlu1 %3857 }
0x1677   :  { %v3879_v12 = vsel %vm1847_vm5, %v3878_v10, %v3858_v5 }
0x1678   :  { %v3880_v23 = vsel %vm3846_vm7, %v3879_v12, %v3862_v31 }
0x1679   :  { %v3886_v21 = vrot.slane %v3880_v23, 7 }
0x167a   :  { %v3820_v6 = vpop.permute.xlu0 %3819  ;;  %v3872_v7 = vpop.permute.xlu1 %3871 }
0x167b   :  { %v3882_v19 = vsel %vm1847_vm5, %v3881_v13, %v3872_v7  ;;  %v3844_v15 = vsel %vm83_vm0, %v3815_v53, %v3820_v6 }
0x167e   :  { %v3876_v8 = vpop.permute.xlu1 %3875  ;;  %v3824_v9 = vpop.permute.xlu0 %3823 }
0x167f   :  { %v3883_v16 = vsel %vm3846_vm7, %v3882_v19, %v3876_v8  ;;  %v3845_v18 = vsel %vm1847_vm5, %v3844_v15, %v3824_v9 }
0x1680   :  { %v3887_v22 = vrot.slane %v3883_v16, 7 }
0x1682   :  { %v3834_v4 = vpop.permute.xlu1 %3833  ;;  %v3828_v14 = vpop.permute.xlu0 %3827 }
0x1683   :  { %v3847_v52 = vsel %vm3846_vm7, %v3845_v18, %v3828_v14  ;;  %v3848_v20 = vsel %vm83_vm0, %v3830_v17, %v3834_v4 }
0x1684   :  { %v3891_v51 = vsel %vm3890_vm6, %v3847_v52, %v3886_v21 }
0x1686   :  { %v3838_v24 = vpop.permute.xlu1 %3837 }
0x1687   :  { %v3849_v25 = vsel %vm1847_vm5, %v3848_v20, %v3838_v24 }
0x168a   :  { %v3842_v47 = vpop.permute.xlu1 %3841 }
0x168b   :  { %v3850_v26 = vsel %vm3846_vm7, %v3849_v25, %v3842_v47 }
0x168c   :  { %v3892_v27 = vsel %vm3890_vm6, %v3850_v26, %v3887_v22 }
0x168d   :  { %v3895_v28 = vcombine.low %v3891_v51, %v3892_v27 }
0x168f   :  { %4133 = vst.sshfl [vmem:[#allocation2] sm:$0x33 pattern:$0x76325410] %v3895_v28 }
0x1690   :  { %4741 = shalt.err (!%p4738_p4)
}
0x1691   :  { %s4742_s27 = scalar_lea.hbm %s5613_s20, 64 }
0x1692   :  { %p4743_p5 = scmp.ne.s32.totalorder %s5613_s20, %s4742_s27  ;;  %p4746_p6 = scmp.lt.u32.totalorder %s4742_s27, %s5613_s20 }
0x1694   :  { %p4748_p7 = pnand %p4746_p6, %p4743_p5 }
0x1696   :  { %4751 = shalt.err (!%p4748_p7)
}
0x1697   :  { %4003 = dma.vmem_to_hbm [thread:$0]  %s4001_s17, 64, %s5613_s20, [#allocation3]   ;;  %v4134_v29 = vld [vmem:[%s5612_s19] ss:$0 sm:$0xff] }
0x1698   :  { %s4791_s14 = smov [#allocation4]  }
0x1699   :  { %s4010_s15 = sshll.u32 %s4791_s14, 4  ;;  %s4011_s15 = int_to_ptr.vmem [resolvable:$true] %s4010_s15 }
0x169a   :  { %s4752_s22 = scalar_lea.vmem %s4011_s15, 32  ;;  %p4757_p9 = scmp.lt.s32.totalorder %s4011_s15, %s4011_s15 }
0x169b   :  { %p4753_p8 = scmp.ne.s32.totalorder %s4011_s15, %s4752_s22  ;;  %p4758_p10 = scmp.lt.s32.totalorder %s4752_s22, %s4752_s22 }
0x169d   :  { %p4759_p11 = por %p4758_p10, %p4757_p9 }
0x169f   :  { %p4760_p12 = pnand %p4759_p11, %p4753_p8 }
0x16d4   :  { %v3987_v30 = vpop.f32.mrb[44].mxu1 }
0x16d5   :  { %v3988_v54 = vadd.f32 %v4134_v29, %v3987_v30  ;;  %v4535_v32 = vpop.f32.mrb[45].mxu1 }
0x16d7   :  { %4728 = vtanh.f32 %v3988_v54 }
0x16e1   :  { %v4729_v34 = vpop.eup %4728 }
0x16e2   :  { %v3992_v35 = vsel %vm83_vm0, %v4729_v34, 0.0 }
0x16e3   :  { %3993 = vst [vmem:[#allocation4] sm:$0x3] %v3992_v35 }
0x16e4   :  { %4763 = shalt.err (!%p4760_p12)
}
0x16e5   :  { %s4764_s28 = scalar_lea.hbm %s5614_s21, 32 }
0x16e6   :  { %p4765_p13 = scmp.ne.s32.totalorder %s5614_s21, %s4764_s28  ;;  %p4768_p0 = scmp.lt.u32.totalorder %s4764_s28, %s5614_s21 }
0x16e8   :  { %p4770_p1 = pnand %p4768_p0, %p4765_p13 }
0x16ea   :  { %4773 = shalt.err (!%p4770_p1)
}
0x16eb   :  { %4013 = dma.vmem_to_hbm [thread:$0]  %s4011_s15, 32, %s5614_s21, [#allocation5]  }
0x16ec   :  { %4774 = dma.done.wait [#allocation3], 64  }
0x16ed   :  { %4775 = vsyncadd [#allocation3], 4294967232 }
0x16ee   :  { %4776 = dma.done.wait [#allocation5], 32  }
0x16ef   :  { %4777 = vsyncadd [#allocation5], 4294967264 }
0x16f0   :  { %4020 = vsyncpa [#allocation3], 1 }
0x16f1   :  { %4021 = vsyncpa [#allocation5], 1 }

</bundles_post_ra>
